<compile_context>
chip_gen: v7x
topology: tpu7x:2x2x1
jax: 0.10.0
libtpu: 0.0.40
codegen_flags: <defaults>
</compile_context>

<pallas_src>
import functools

import numpy as np
import jax
import jax.numpy as jnp
from jax.experimental import pallas as pl
from jax.experimental.pallas import tpu as pltpu

# ----------------------------------------------------------------------------- config
NODE_TYPES = ("cons", "vals", "obj")
EDGE_TYPES = (("cons", "vals"), ("vals", "cons"), ("vals", "obj"),
              ("obj", "vals"), ("cons", "obj"), ("obj", "cons"))
# HeteroConv(aggr='cat') concatenation order per destination (PyG ModuleDict order)
DST_ORDER = {
    "vals": (("cons", "vals"), ("obj", "vals")),
    "cons": (("vals", "cons"), ("obj", "cons")),
    "obj":  (("vals", "obj"), ("cons", "obj")),
}
SLOT = {et: j for d in NODE_TYPES for j, et in enumerate(DST_ORDER[d])}

IN_SHAPE = 4
HID_DIM = 16
EMB_DIM = 2 * HID_DIM          # 32
NUM_CONV_LAYERS = 2
NUM_RELATIONS = len(EDGE_TYPES)
GINE_EPS = 0.0
PACK_LANES = 96                # widest packed constant (the 6*H MLP blocks)


# ----------------------------------------------------------------------------- packing
def _round8(n):
    return ((n + 7) // 8) * 8


def _pack_constants(arrays):
    """Pack a dict of small 2-D f32 arrays into one [R, PACK_LANES] buffer.

    Row offsets are 8-aligned; offsets[name] = (row_offset, rows, cols) are static
    Python ints used for zero-cost static slicing inside the kernel."""
    offsets = {}
    rows = 0
    for name, a in arrays.items():
        a = np.asarray(a, np.float32)
        assert a.ndim == 2 and a.shape[1] <= PACK_LANES, (name, a.shape)
        offsets[name] = (rows, a.shape[0], a.shape[1])
        rows += _round8(a.shape[0])
    buf = np.zeros((rows, PACK_LANES), np.float32)
    for name, a in arrays.items():
        a = np.asarray(a, np.float32)
        r0, r, c = offsets[name]
        buf[r0:r0 + r, :c] = a
    return jnp.asarray(buf), offsets


# ----------------------------------------------------------------------------- kernel
def _fused_forward_kernel(x_ref, ea_ref, p_ref, vals_ref, cons_ref, *, offs):
    """Entire TripartiteHeteroGNN forward in one kernel (single block, no grid)."""

    def get(name):
        r0, nr, nc = offs[name]
        return p_ref[pl.ds(r0, nr), pl.ds(0, nc)]

    def dot(a, b):
        return jnp.dot(a, b, preferred_element_type=jnp.float32)

    x_in = x_ref[...]                                   # [N, in_shape] stacked nodes
    ea = ea_ref[...]                                    # [E_total, 1]  stacked edges

    # ---- encoders: 3 per-type MLPs batched (row-block masks keep types separate)
    pre = dot(x_in, get("enc_w1"))                      # [N, 3H]
    h = jnp.maximum(pre + get("enc_b1"), 0.0) * get("enc_mask")
    x = dot(h, get("enc_w2")) + get("enc_b2")           # [N, 2H]

    # ---- graph operators (dense 0/1, built once host-side, shared by both layers)
    G = get("G")                                        # [E_total, N]  src gather
    S = get("S")                                        # [R36, E_total] scatter-sum
    D = get("D")                                        # [R36, N]  (1+eps)*dst gather
    Fv = get("Fv")                                      # [Nv, R36] fold -> vals rows
    Fc = get("Fc")                                      # [Nc, R36] fold -> cons rows
    mlp_mask = get("mlp_mask")                          # [R36, 6H] relation blocks

    h2v_layers, h2c_layers = [], []
    for l in range(NUM_CONV_LAYERS):
        # GINE messages for all 6 relations at once
        gathered = dot(G, x)                                            # [E, 2H]
        msg = jnp.maximum(gathered + ea * get(f"edge_w{l}") + get(f"edge_b{l}"), 0.0)
        gine = dot(D, x) + dot(S, msg)                                  # [R36, 2H]
        # per-relation conv MLP batched: block-structured weights + row-block mask
        hm = jnp.maximum(dot(gine, get(f"wm1_{l}")) + get(f"bm1_{l}"), 0.0) * mlp_mask
        o36 = dot(hm, get(f"wm2_{l}"))                                  # [R36, 2H] (cat slots)
        # fold (relation, dst-node) rows into per-destination node rows
        h2v_layers.append(dot(Fv, o36) + get(f"b2fv_{l}"))              # [Nv, 2H]
        h2c_layers.append(dot(Fc, o36) + get(f"b2fc_{l}"))              # [Nc, 2H]
        if l + 1 < NUM_CONV_LAYERS:                     # residual only feeds next layer
            h2_full = dot(get("F"), o36) + get(f"b2f_{l}")              # [N, 2H]
            x = (jnp.maximum(h2_full, 0.0) + x) * 0.5   # use_res; dropout(p=0)=id

    # ---- prediction heads (per-layer MLPs; layer l lands in output column l)
    for fam, h2_layers, out_ref in (("vals", h2v_layers, vals_ref),
                                    ("cons", h2c_layers, cons_ref)):
        acc = None
        for l in range(NUM_CONV_LAYERS):
            t = jnp.maximum(dot(h2_layers[l], get(f"{fam}_w1_{l}"))
                            + get(f"{fam}_b1_{l}"), 0.0)
            c = dot(t, get(f"{fam}_w2_{l}"))
            acc = c if acc is None else acc + c
        out_ref[...] = acc + get(f"{fam}_b2")           # pre-summed output biases


# ----------------------------------------------------------------------------- prep
def prepare_constants(params, n_nodes, edge_index_dict, eps=GINE_EPS):
    """One-time host-side prep: block-structured weights, masks, biases and dense
    0/1 graph operators, all packed into a single [R, 96] f32 buffer."""
    H, EMB, R, L = HID_DIM, EMB_DIM, NUM_RELATIONS, NUM_CONV_LAYERS

    node_off, off = {}, 0
    for t in NODE_TYPES:
        node_off[t] = off
        off += n_nodes[t]
    N = off

    e_counts = [int(np.asarray(edge_index_dict[et]).shape[1]) for et in EDGE_TYPES]
    edge_off = np.concatenate([[0], np.cumsum(e_counts)]).astype(int)
    ET = int(edge_off[-1])

    rel_off, off36 = [], 0
    for (_, d) in EDGE_TYPES:
        rel_off.append(off36)
        off36 += n_nodes[d]
    R36 = off36

    arrays = {}

    # --- encoders: batched into 2 matmuls over the stacked node rows
    enc = params["encoder"]
    arrays["enc_w1"] = np.concatenate([np.asarray(enc[t]["w1"]) for t in NODE_TYPES], axis=1)
    arrays["enc_w2"] = np.concatenate([np.asarray(enc[t]["w2"]) for t in NODE_TYPES], axis=0)
    enc_mask = np.zeros((N, 3 * H), np.float32)
    enc_b1 = np.zeros((N, 3 * H), np.float32)
    enc_b2 = np.zeros((N, EMB), np.float32)
    for ti, t in enumerate(NODE_TYPES):
        r0, r1 = node_off[t], node_off[t] + n_nodes[t]
        enc_mask[r0:r1, ti * H:(ti + 1) * H] = 1.0
        enc_b1[r0:r1, ti * H:(ti + 1) * H] = np.asarray(enc[t]["b1"])[None, :]
        enc_b2[r0:r1, :] = np.asarray(enc[t]["b2"])[None, :]
    arrays["enc_mask"], arrays["enc_b1"], arrays["enc_b2"] = enc_mask, enc_b1, enc_b2

    # --- row-block mask selecting each relation's 16-wide conv-MLP column block
    mlp_mask = np.zeros((R36, R * H), np.float32)
    for r, (_, d) in enumerate(EDGE_TYPES):
        mlp_mask[rel_off[r]:rel_off[r] + n_nodes[d], r * H:(r + 1) * H] = 1.0
    arrays["mlp_mask"] = mlp_mask

    # --- per-layer conv weights (block-structured; 'cat' folded into wm2 slots)
    for l, lp in enumerate(params["convs"]):
        edge_w = np.zeros((ET, EMB), np.float32)
        edge_b = np.zeros((ET, EMB), np.float32)
        wm1 = np.zeros((EMB, R * H), np.float32)
        bm1 = np.zeros((R36, R * H), np.float32)
        wm2 = np.zeros((R * H, EMB), np.float32)
        b2f = np.zeros((N, EMB), np.float32)
        for r, et in enumerate(EDGE_TYPES):
            _, d = et
            p = lp[et]
            e0, e1 = int(edge_off[r]), int(edge_off[r + 1])
            edge_w[e0:e1, :] = np.asarray(p["we"])[None, :]
            edge_b[e0:e1, :] = np.asarray(p["be"])[None, :]
            wm1[:, r * H:(r + 1) * H] = np.asarray(p["wm1"])
            bm1[rel_off[r]:rel_off[r] + n_nodes[d], r * H:(r + 1) * H] = \
                np.asarray(p["bm1"])[None, :]
            sl = SLOT[et]
            wm2[r * H:(r + 1) * H, sl * H:(sl + 1) * H] = np.asarray(p["wm2"])
            d0 = node_off[d]
            b2f[d0:d0 + n_nodes[d], sl * H:(sl + 1) * H] += np.asarray(p["bm2"])[None, :]
        arrays[f"edge_w{l}"] = edge_w
        arrays[f"edge_b{l}"] = edge_b
        arrays[f"wm1_{l}"] = wm1
        arrays[f"bm1_{l}"] = bm1
        arrays[f"wm2_{l}"] = wm2
        arrays[f"b2f_{l}"] = b2f
        arrays[f"b2fv_{l}"] = b2f[node_off["vals"]:node_off["vals"] + n_nodes["vals"]]
        arrays[f"b2fc_{l}"] = b2f[node_off["cons"]:node_off["cons"] + n_nodes["cons"]]

    # --- prediction heads: lane-widened second linear; output biases pre-summed
    for fam in ("vals", "cons"):
        b2sum = np.zeros((1, L), np.float32)
        for l, p in enumerate(params["pred_" + fam]):
            arrays[f"{fam}_w1_{l}"] = np.asarray(p["w1"])
            arrays[f"{fam}_b1_{l}"] = np.asarray(p["b1"])[None, :]
            w2w = np.zeros((H, L), np.float32)
            w2w[:, l:l + 1] = np.asarray(p["w2"])
            arrays[f"{fam}_w2_{l}"] = w2w
            b2sum[0, l] = float(np.asarray(p["b2"])[0])
        arrays[f"{fam}_b2"] = b2sum

    # --- dense 0/1 graph operators: gather / scatter-sum / dst-gather / fold
    G = np.zeros((ET, N), np.float32)
    S = np.zeros((R36, ET), np.float32)
    D = np.zeros((R36, N), np.float32)
    F = np.zeros((N, R36), np.float32)
    for r, (s, d) in enumerate(EDGE_TYPES):
        ei = np.asarray(edge_index_dict[(s, d)])
        for e in range(e_counts[r]):
            ge = int(edge_off[r]) + e
            G[ge, node_off[s] + int(ei[0, e])] = 1.0
            S[rel_off[r] + int(ei[1, e]), ge] += 1.0
        for j in range(n_nodes[d]):
            k = rel_off[r] + j
            D[k, node_off[d] + j] = 1.0 + eps
            F[node_off[d] + j, k] = 1.0
    arrays["G"], arrays["S"], arrays["D"], arrays["F"] = G, S, D, F
    arrays["Fv"] = F[node_off["vals"]:node_off["vals"] + n_nodes["vals"]]
    arrays["Fc"] = F[node_off["cons"]:node_off["cons"] + n_nodes["cons"]]

    buf, offsets = _pack_constants(arrays)
    meta = {"offs": offsets, "n_vals": n_nodes["vals"], "n_cons": n_nodes["cons"]}
    return buf, meta


def build_forward(meta):
    kernel = functools.partial(_fused_forward_kernel, offs=meta["offs"])
    n_vals, n_cons = meta["n_vals"], meta["n_cons"]

    @jax.jit
    def forward(const_buf, x_dict, edge_attr_dict):
        x = jnp.concatenate([x_dict[t] for t in NODE_TYPES], axis=0).astype(jnp.float32)
        ea = jnp.concatenate([edge_attr_dict[et] for et in EDGE_TYPES], axis=0
                             ).astype(jnp.float32)
        return pl.pallas_call(
            kernel,
            out_shape=(jax.ShapeDtypeStruct((n_vals, NUM_CONV_LAYERS), jnp.float32),
                       jax.ShapeDtypeStruct((n_cons, NUM_CONV_LAYERS), jnp.float32)),
            compiler_params=pltpu.CompilerParams(vmem_limit_bytes=32 * 1024 * 1024),
        )(x, ea, const_buf)

    return forward


# ----------------------------------------------------------------------------- params
def _init_linear(key, fan_in, fan_out):
    kw, kb = jax.random.split(key)
    scale = 1.0 / (fan_in ** 0.5)
    w = jax.random.uniform(kw, (fan_in, fan_out), jnp.float32, -scale, scale)
    b = jax.random.uniform(kb, (fan_out,), jnp.float32, -scale, scale)
    return w, b


def init_params(key):
    H = HID_DIM
    params = {"encoder": {}, "convs": [], "pred_vals": [], "pred_cons": []}
    for k in NODE_TYPES:                       # encoder MLP([in, H, 2H], norm='batch')
        key, k1, k2 = jax.random.split(key, 3)
        w1, b1 = _init_linear(k1, IN_SHAPE, H)
        w2, b2 = _init_linear(k2, H, EMB_DIM)
        params["encoder"][k] = {"w1": w1, "b1": b1, "w2": w2, "b2": b2}
    for _ in range(NUM_CONV_LAYERS):           # per-layer, per-edge-type GINE conv
        layer_p = {}
        for et in EDGE_TYPES:
            key, ke, k1, k2 = jax.random.split(key, 4)
            we, be = _init_linear(ke, 1, EMB_DIM)         # edge Linear(1 -> 2H)
            wm1, bm1 = _init_linear(k1, EMB_DIM, H)       # conv MLP: 2H -> H -> H
            wm2, bm2 = _init_linear(k2, H, H)
            layer_p[et] = {"we": we[0], "be": be,
                           "wm1": wm1, "bm1": bm1, "wm2": wm2, "bm2": bm2}
        params["convs"].append(layer_p)
    for _ in range(NUM_CONV_LAYERS):           # per-layer heads: MLP([2H, H, 1])
        key, k1, k2, k3, k4 = jax.random.split(key, 5)
        wv1, bv1 = _init_linear(k1, EMB_DIM, H)
        wv2, bv2 = _init_linear(k2, H, 1)
        wc1, bc1 = _init_linear(k3, EMB_DIM, H)
        wc2, bc2 = _init_linear(k4, H, 1)
        params["pred_vals"].append({"w1": wv1, "b1": bv1, "w2": wv2, "b2": bv2})
        params["pred_cons"].append({"w1": wc1, "b1": bc1, "w2": wc2, "b2": bc2})
    return params


# ----------------------------------------------------------------------------- reference
def reference_forward(params, x_dict, edge_index_dict, edge_attr_dict, eps=GINE_EPS):
    """Plain-JAX per-relation reference (checks the batched/packed kernel math)."""
    x = {}
    for t in NODE_TYPES:
        p = params["encoder"][t]
        h = jax.nn.relu(x_dict[t] @ p["w1"] + p["b1"])
        x[t] = h @ p["w2"] + p["b2"]
    hiddens = []
    for l in range(NUM_CONV_LAYERS):
        lp = params["convs"][l]
        per_dst = {t: [] for t in NODE_TYPES}
        for et in EDGE_TYPES:
            s, d = et
            p = lp[et]
            src, dst = edge_index_dict[et][0], edge_index_dict[et][1]
            ea = edge_attr_dict[et]
            msg = jax.nn.relu(x[s][src] + ea * p["we"][None, :] + p["be"][None, :])
            agg = jnp.zeros_like(x[d]).at[dst].add(msg)
            gine = (1.0 + eps) * x[d] + agg
            hm = jax.nn.relu(gine @ p["wm1"] + p["bm1"])
            per_dst[d].append(hm @ p["wm2"] + p["bm2"])
        h2 = {d: jnp.concatenate(per_dst[d], axis=1) for d in NODE_TYPES}
        hiddens.append((h2["cons"], h2["vals"]))
        x = {t: (jax.nn.relu(h2[t]) + x[t]) * 0.5 for t in NODE_TYPES}

    def head(plist, hs):
        cols = []
        for l in range(NUM_CONV_LAYERS):
            p = plist[l]
            t = jax.nn.relu(hs[l] @ p["w1"] + p["b1"])
            cols.append(t @ p["w2"] + p["b2"])
        return jnp.concatenate(cols, axis=1)

    vals = head(params["pred_vals"], [h[1] for h in hiddens])
    cons = head(params["pred_cons"], [h[0] for h in hiddens])
    return vals, cons


# ----------------------------------------------------------------------------- main
if __name__ == "__main__":
    key = jax.random.PRNGKey(0)
    n_nodes = {"cons": 6, "vals": 10, "obj": 2}
    n_edges = 12

    key, kx_c, kx_v, kx_o = jax.random.split(key, 4)
    x_dict = {
        "cons": jax.random.normal(kx_c, (n_nodes["cons"], IN_SHAPE), jnp.float32),
        "vals": jax.random.normal(kx_v, (n_nodes["vals"], IN_SHAPE), jnp.float32),
        "obj":  jax.random.normal(kx_o, (n_nodes["obj"], IN_SHAPE), jnp.float32),
    }

    edge_index_dict, edge_attr_dict = {}, {}
    for (src, dst) in EDGE_TYPES:
        key, ks, kd, ka = jax.random.split(key, 4)
        ei = jnp.stack([
            jax.random.randint(ks, (n_edges,), 0, n_nodes[src]),
            jax.random.randint(kd, (n_edges,), 0, n_nodes[dst]),
        ], axis=0)                                             # [2, E]
        edge_index_dict[(src, dst)] = ei
        edge_attr_dict[(src, dst)] = jax.random.normal(ka, (n_edges, 1), jnp.float32)

    key, kp = jax.random.split(key)
    params = init_params(kp)

    const_buf, meta = prepare_constants(params, n_nodes, edge_index_dict)   # one-time
    forward = build_forward(meta)

    vals, cons = forward(const_buf, x_dict, edge_attr_dict)
    jax.block_until_ready((vals, cons))

    assert vals.shape == (n_nodes["vals"], NUM_CONV_LAYERS)
    assert cons.shape == (n_nodes["cons"], NUM_CONV_LAYERS)

    vals_ref, cons_ref = reference_forward(params, x_dict, edge_index_dict,
                                           edge_attr_dict)
    # loose tolerance: kernel and plain-JAX reference may use different MXU
    # f32 matmul pass decompositions; structural bugs would be O(0.1+).
    assert jnp.allclose(vals, vals_ref, rtol=2e-2, atol=2e-2)
    assert jnp.allclose(cons, cons_ref, rtol=2e-2, atol=2e-2)

    print("KERNEL_OK")
</pallas_src>

<mosaic_0001>
module attributes {stable_mosaic.version = 11 : i64} {
  func.func @_fused_forward_kernel(%arg0: memref<18x4xf32, #tpu.memory_space<vmem>>, %arg1: memref<72x1xf32, #tpu.memory_space<vmem>>, %arg2: memref<1328x96xf32, #tpu.memory_space<vmem>>, %arg3: memref<10x2xf32, #tpu.memory_space<vmem>>, %arg4: memref<6x2xf32, #tpu.memory_space<vmem>>) attributes {dimension_semantics = [], scalar_prefetch = 0 : i64, scratch_operands = 0 : i64, tpu.core_type = #tpu.core_type<tc>} {
    %c0 = arith.constant 0 : index
    %c0_0 = arith.constant 0 : index
    %0 = vector.load %arg0[%c0, %c0_0] : memref<18x4xf32, #tpu.memory_space<vmem>>, vector<18x4xf32>
    %c0_1 = arith.constant 0 : index
    %c0_2 = arith.constant 0 : index
    %1 = vector.load %arg1[%c0_1, %c0_2] : memref<72x1xf32, #tpu.memory_space<vmem>>, vector<72x1xf32>
    %c0_3 = arith.constant 0 : index
    %c0_4 = arith.constant 0 : index
    %2 = vector.load %arg2[%c0_3, %c0_4] : memref<1328x96xf32, #tpu.memory_space<vmem>>, vector<4x48xf32>
    %cst = arith.constant dense<0.000000e+00> : vector<18x48xf32>
    %3 = tpu.matmul %0, %2, %cst {dimension_numbers = #tpu.dot_dimension_numbers<[1], [0], [0], [1], [0, 0, 1, 1], [], []>} : vector<18x4xf32>, vector<4x48xf32>, vector<18x48xf32> -> vector<18x48xf32>
    %c80 = arith.constant 80 : index
    %c0_5 = arith.constant 0 : index
    %4 = vector.load %arg2[%c80, %c0_5] : memref<1328x96xf32, #tpu.memory_space<vmem>>, vector<18x48xf32>
    %5 = arith.addf %3, %4 : vector<18x48xf32>
    %cst_6 = arith.constant 0.000000e+00 : f32
    %6 = vector.broadcast %cst_6 : f32 to vector<18x48xf32>
    %7 = arith.maximumf %5, %6 : vector<18x48xf32>
    %c56 = arith.constant 56 : index
    %c0_7 = arith.constant 0 : index
    %8 = vector.load %arg2[%c56, %c0_7] : memref<1328x96xf32, #tpu.memory_space<vmem>>, vector<18x48xf32>
    %9 = arith.mulf %7, %8 : vector<18x48xf32>
    %c8 = arith.constant 8 : index
    %c0_8 = arith.constant 0 : index
    %10 = vector.load %arg2[%c8, %c0_8] : memref<1328x96xf32, #tpu.memory_space<vmem>>, vector<48x32xf32>
    %cst_9 = arith.constant dense<0.000000e+00> : vector<18x32xf32>
    %11 = tpu.matmul %9, %10, %cst_9 {dimension_numbers = #tpu.dot_dimension_numbers<[1], [0], [0], [1], [0, 0, 1, 1], [], []>} : vector<18x48xf32>, vector<48x32xf32>, vector<18x32xf32> -> vector<18x32xf32>
    %c104 = arith.constant 104 : index
    %c0_10 = arith.constant 0 : index
    %12 = vector.load %arg2[%c104, %c0_10] : memref<1328x96xf32, #tpu.memory_space<vmem>>, vector<18x32xf32>
    %13 = arith.addf %11, %12 : vector<18x32xf32>
    %c1128 = arith.constant 1128 : index
    %c0_11 = arith.constant 0 : index
    %14 = vector.load %arg2[%c1128, %c0_11] : memref<1328x96xf32, #tpu.memory_space<vmem>>, vector<72x18xf32>
    %c1200 = arith.constant 1200 : index
    %c0_12 = arith.constant 0 : index
    %15 = vector.load %arg2[%c1200, %c0_12] : memref<1328x96xf32, #tpu.memory_space<vmem>>, vector<36x72xf32>
    %c1240 = arith.constant 1240 : index
    %c0_13 = arith.constant 0 : index
    %16 = vector.load %arg2[%c1240, %c0_13] : memref<1328x96xf32, #tpu.memory_space<vmem>>, vector<36x18xf32>
    %c1304 = arith.constant 1304 : index
    %c0_14 = arith.constant 0 : index
    %17 = vector.load %arg2[%c1304, %c0_14] : memref<1328x96xf32, #tpu.memory_space<vmem>>, vector<10x36xf32>
    %c1320 = arith.constant 1320 : index
    %c0_15 = arith.constant 0 : index
    %18 = vector.load %arg2[%c1320, %c0_15] : memref<1328x96xf32, #tpu.memory_space<vmem>>, vector<6x36xf32>
    %c128 = arith.constant 128 : index
    %c0_16 = arith.constant 0 : index
    %19 = vector.load %arg2[%c128, %c0_16] : memref<1328x96xf32, #tpu.memory_space<vmem>>, vector<36x96xf32>
    %cst_17 = arith.constant dense<0.000000e+00> : vector<72x32xf32>
    %20 = tpu.matmul %14, %13, %cst_17 {dimension_numbers = #tpu.dot_dimension_numbers<[1], [0], [0], [1], [0, 0, 1, 1], [], []>} : vector<72x18xf32>, vector<18x32xf32>, vector<72x32xf32> -> vector<72x32xf32>
    %c168 = arith.constant 168 : index
    %c0_18 = arith.constant 0 : index
    %21 = vector.load %arg2[%c168, %c0_18] : memref<1328x96xf32, #tpu.memory_space<vmem>>, vector<72x32xf32>
    %22 = vector.broadcast %1 : vector<72x1xf32> to vector<72x32xf32>
    %23 = arith.mulf %22, %21 : vector<72x32xf32>
    %24 = arith.addf %20, %23 : vector<72x32xf32>
    %c240 = arith.constant 240 : index
    %c0_19 = arith.constant 0 : index
    %25 = vector.load %arg2[%c240, %c0_19] : memref<1328x96xf32, #tpu.memory_space<vmem>>, vector<72x32xf32>
    %26 = arith.addf %24, %25 : vector<72x32xf32>
    %cst_20 = arith.constant 0.000000e+00 : f32
    %27 = vector.broadcast %cst_20 : f32 to vector<72x32xf32>
    %28 = arith.maximumf %26, %27 : vector<72x32xf32>
    %cst_21 = arith.constant dense<0.000000e+00> : vector<36x32xf32>
    %29 = tpu.matmul %16, %13, %cst_21 {dimension_numbers = #tpu.dot_dimension_numbers<[1], [0], [0], [1], [0, 0, 1, 1], [], []>} : vector<36x18xf32>, vector<18x32xf32>, vector<36x32xf32> -> vector<36x32xf32>
    %cst_22 = arith.constant dense<0.000000e+00> : vector<36x32xf32>
    %30 = tpu.matmul %15, %28, %cst_22 {dimension_numbers = #tpu.dot_dimension_numbers<[1], [0], [0], [1], [0, 0, 1, 1], [], []>} : vector<36x72xf32>, vector<72x32xf32>, vector<36x32xf32> -> vector<36x32xf32>
    %31 = arith.addf %29, %30 : vector<36x32xf32>
    %c312 = arith.constant 312 : index
    %c0_23 = arith.constant 0 : index
    %32 = vector.load %arg2[%c312, %c0_23] : memref<1328x96xf32, #tpu.memory_space<vmem>>, vector<32x96xf32>
    %cst_24 = arith.constant dense<0.000000e+00> : vector<36x96xf32>
    %33 = tpu.matmul %31, %32, %cst_24 {dimension_numbers = #tpu.dot_dimension_numbers<[1], [0], [0], [1], [0, 0, 1, 1], [], []>} : vector<36x32xf32>, vector<32x96xf32>, vector<36x96xf32> -> vector<36x96xf32>
    %c344 = arith.constant 344 : index
    %c0_25 = arith.constant 0 : index
    %34 = vector.load %arg2[%c344, %c0_25] : memref<1328x96xf32, #tpu.memory_space<vmem>>, vector<36x96xf32>
    %35 = arith.addf %33, %34 : vector<36x96xf32>
    %cst_26 = arith.constant 0.000000e+00 : f32
    %36 = vector.broadcast %cst_26 : f32 to vector<36x96xf32>
    %37 = arith.maximumf %35, %36 : vector<36x96xf32>
    %38 = arith.mulf %37, %19 : vector<36x96xf32>
    %c384 = arith.constant 384 : index
    %c0_27 = arith.constant 0 : index
    %39 = vector.load %arg2[%c384, %c0_27] : memref<1328x96xf32, #tpu.memory_space<vmem>>, vector<96x32xf32>
    %cst_28 = arith.constant dense<0.000000e+00> : vector<36x32xf32>
    %40 = tpu.matmul %38, %39, %cst_28 {dimension_numbers = #tpu.dot_dimension_numbers<[1], [0], [0], [1], [0, 0, 1, 1], [], []>} : vector<36x96xf32>, vector<96x32xf32>, vector<36x32xf32> -> vector<36x32xf32>
    %cst_29 = arith.constant dense<0.000000e+00> : vector<10x32xf32>
    %41 = tpu.matmul %17, %40, %cst_29 {dimension_numbers = #tpu.dot_dimension_numbers<[1], [0], [0], [1], [0, 0, 1, 1], [], []>} : vector<10x36xf32>, vector<36x32xf32>, vector<10x32xf32> -> vector<10x32xf32>
    %c504 = arith.constant 504 : index
    %c0_30 = arith.constant 0 : index
    %42 = vector.load %arg2[%c504, %c0_30] : memref<1328x96xf32, #tpu.memory_space<vmem>>, vector<10x32xf32>
    %43 = arith.addf %41, %42 : vector<10x32xf32>
    %cst_31 = arith.constant dense<0.000000e+00> : vector<6x32xf32>
    %44 = tpu.matmul %18, %40, %cst_31 {dimension_numbers = #tpu.dot_dimension_numbers<[1], [0], [0], [1], [0, 0, 1, 1], [], []>} : vector<6x36xf32>, vector<36x32xf32>, vector<6x32xf32> -> vector<6x32xf32>
    %c520 = arith.constant 520 : index
    %c0_32 = arith.constant 0 : index
    %45 = vector.load %arg2[%c520, %c0_32] : memref<1328x96xf32, #tpu.memory_space<vmem>>, vector<6x32xf32>
    %46 = arith.addf %44, %45 : vector<6x32xf32>
    %c1280 = arith.constant 1280 : index
    %c0_33 = arith.constant 0 : index
    %47 = vector.load %arg2[%c1280, %c0_33] : memref<1328x96xf32, #tpu.memory_space<vmem>>, vector<18x36xf32>
    %cst_34 = arith.constant dense<0.000000e+00> : vector<18x32xf32>
    %48 = tpu.matmul %47, %40, %cst_34 {dimension_numbers = #tpu.dot_dimension_numbers<[1], [0], [0], [1], [0, 0, 1, 1], [], []>} : vector<18x36xf32>, vector<36x32xf32>, vector<18x32xf32> -> vector<18x32xf32>
    %c480 = arith.constant 480 : index
    %c0_35 = arith.constant 0 : index
    %49 = vector.load %arg2[%c480, %c0_35] : memref<1328x96xf32, #tpu.memory_space<vmem>>, vector<18x32xf32>
    %50 = arith.addf %48, %49 : vector<18x32xf32>
    %cst_36 = arith.constant 0.000000e+00 : f32
    %51 = vector.broadcast %cst_36 : f32 to vector<18x32xf32>
    %52 = arith.maximumf %50, %51 : vector<18x32xf32>
    %53 = arith.addf %52, %13 : vector<18x32xf32>
    %cst_37 = arith.constant 5.000000e-01 : f32
    %54 = vector.broadcast %cst_37 : f32 to vector<18x32xf32>
    %55 = arith.mulf %53, %54 : vector<18x32xf32>
    %cst_38 = arith.constant dense<0.000000e+00> : vector<72x32xf32>
    %56 = tpu.matmul %14, %55, %cst_38 {dimension_numbers = #tpu.dot_dimension_numbers<[1], [0], [0], [1], [0, 0, 1, 1], [], []>} : vector<72x18xf32>, vector<18x32xf32>, vector<72x32xf32> -> vector<72x32xf32>
    %c528 = arith.constant 528 : index
    %c0_39 = arith.constant 0 : index
    %57 = vector.load %arg2[%c528, %c0_39] : memref<1328x96xf32, #tpu.memory_space<vmem>>, vector<72x32xf32>
    %58 = vector.broadcast %1 : vector<72x1xf32> to vector<72x32xf32>
    %59 = arith.mulf %58, %57 : vector<72x32xf32>
    %60 = arith.addf %56, %59 : vector<72x32xf32>
    %c600 = arith.constant 600 : index
    %c0_40 = arith.constant 0 : index
    %61 = vector.load %arg2[%c600, %c0_40] : memref<1328x96xf32, #tpu.memory_space<vmem>>, vector<72x32xf32>
    %62 = arith.addf %60, %61 : vector<72x32xf32>
    %cst_41 = arith.constant 0.000000e+00 : f32
    %63 = vector.broadcast %cst_41 : f32 to vector<72x32xf32>
    %64 = arith.maximumf %62, %63 : vector<72x32xf32>
    %cst_42 = arith.constant dense<0.000000e+00> : vector<36x32xf32>
    %65 = tpu.matmul %16, %55, %cst_42 {dimension_numbers = #tpu.dot_dimension_numbers<[1], [0], [0], [1], [0, 0, 1, 1], [], []>} : vector<36x18xf32>, vector<18x32xf32>, vector<36x32xf32> -> vector<36x32xf32>
    %cst_43 = arith.constant dense<0.000000e+00> : vector<36x32xf32>
    %66 = tpu.matmul %15, %64, %cst_43 {dimension_numbers = #tpu.dot_dimension_numbers<[1], [0], [0], [1], [0, 0, 1, 1], [], []>} : vector<36x72xf32>, vector<72x32xf32>, vector<36x32xf32> -> vector<36x32xf32>
    %67 = arith.addf %65, %66 : vector<36x32xf32>
    %c672 = arith.constant 672 : index
    %c0_44 = arith.constant 0 : index
    %68 = vector.load %arg2[%c672, %c0_44] : memref<1328x96xf32, #tpu.memory_space<vmem>>, vector<32x96xf32>
    %cst_45 = arith.constant dense<0.000000e+00> : vector<36x96xf32>
    %69 = tpu.matmul %67, %68, %cst_45 {dimension_numbers = #tpu.dot_dimension_numbers<[1], [0], [0], [1], [0, 0, 1, 1], [], []>} : vector<36x32xf32>, vector<32x96xf32>, vector<36x96xf32> -> vector<36x96xf32>
    %c704 = arith.constant 704 : index
    %c0_46 = arith.constant 0 : index
    %70 = vector.load %arg2[%c704, %c0_46] : memref<1328x96xf32, #tpu.memory_space<vmem>>, vector<36x96xf32>
    %71 = arith.addf %69, %70 : vector<36x96xf32>
    %cst_47 = arith.constant 0.000000e+00 : f32
    %72 = vector.broadcast %cst_47 : f32 to vector<36x96xf32>
    %73 = arith.maximumf %71, %72 : vector<36x96xf32>
    %74 = arith.mulf %73, %19 : vector<36x96xf32>
    %c744 = arith.constant 744 : index
    %c0_48 = arith.constant 0 : index
    %75 = vector.load %arg2[%c744, %c0_48] : memref<1328x96xf32, #tpu.memory_space<vmem>>, vector<96x32xf32>
    %cst_49 = arith.constant dense<0.000000e+00> : vector<36x32xf32>
    %76 = tpu.matmul %74, %75, %cst_49 {dimension_numbers = #tpu.dot_dimension_numbers<[1], [0], [0], [1], [0, 0, 1, 1], [], []>} : vector<36x96xf32>, vector<96x32xf32>, vector<36x32xf32> -> vector<36x32xf32>
    %cst_50 = arith.constant dense<0.000000e+00> : vector<10x32xf32>
    %77 = tpu.matmul %17, %76, %cst_50 {dimension_numbers = #tpu.dot_dimension_numbers<[1], [0], [0], [1], [0, 0, 1, 1], [], []>} : vector<10x36xf32>, vector<36x32xf32>, vector<10x32xf32> -> vector<10x32xf32>
    %c864 = arith.constant 864 : index
    %c0_51 = arith.constant 0 : index
    %78 = vector.load %arg2[%c864, %c0_51] : memref<1328x96xf32, #tpu.memory_space<vmem>>, vector<10x32xf32>
    %79 = arith.addf %77, %78 : vector<10x32xf32>
    %cst_52 = arith.constant dense<0.000000e+00> : vector<6x32xf32>
    %80 = tpu.matmul %18, %76, %cst_52 {dimension_numbers = #tpu.dot_dimension_numbers<[1], [0], [0], [1], [0, 0, 1, 1], [], []>} : vector<6x36xf32>, vector<36x32xf32>, vector<6x32xf32> -> vector<6x32xf32>
    %c880 = arith.constant 880 : index
    %c0_53 = arith.constant 0 : index
    %81 = vector.load %arg2[%c880, %c0_53] : memref<1328x96xf32, #tpu.memory_space<vmem>>, vector<6x32xf32>
    %82 = arith.addf %80, %81 : vector<6x32xf32>
    %c888 = arith.constant 888 : index
    %c0_54 = arith.constant 0 : index
    %83 = vector.load %arg2[%c888, %c0_54] : memref<1328x96xf32, #tpu.memory_space<vmem>>, vector<32x16xf32>
    %cst_55 = arith.constant dense<0.000000e+00> : vector<10x16xf32>
    %84 = tpu.matmul %43, %83, %cst_55 {dimension_numbers = #tpu.dot_dimension_numbers<[1], [0], [0], [1], [0, 0, 1, 1], [], []>} : vector<10x32xf32>, vector<32x16xf32>, vector<10x16xf32> -> vector<10x16xf32>
    %c920 = arith.constant 920 : index
    %c0_56 = arith.constant 0 : index
    %85 = vector.load %arg2[%c920, %c0_56] : memref<1328x96xf32, #tpu.memory_space<vmem>>, vector<1x16xf32>
    %86 = vector.broadcast %85 : vector<1x16xf32> to vector<10x16xf32>
    %87 = arith.addf %84, %86 : vector<10x16xf32>
    %cst_57 = arith.constant 0.000000e+00 : f32
    %88 = vector.broadcast %cst_57 : f32 to vector<10x16xf32>
    %89 = arith.maximumf %87, %88 : vector<10x16xf32>
    %c928 = arith.constant 928 : index
    %c0_58 = arith.constant 0 : index
    %90 = vector.load %arg2[%c928, %c0_58] : memref<1328x96xf32, #tpu.memory_space<vmem>>, vector<16x2xf32>
    %cst_59 = arith.constant dense<0.000000e+00> : vector<10x2xf32>
    %91 = tpu.matmul %89, %90, %cst_59 {dimension_numbers = #tpu.dot_dimension_numbers<[1], [0], [0], [1], [0, 0, 1, 1], [], []>} : vector<10x16xf32>, vector<16x2xf32>, vector<10x2xf32> -> vector<10x2xf32>
    %c944 = arith.constant 944 : index
    %c0_60 = arith.constant 0 : index
    %92 = vector.load %arg2[%c944, %c0_60] : memref<1328x96xf32, #tpu.memory_space<vmem>>, vector<32x16xf32>
    %cst_61 = arith.constant dense<0.000000e+00> : vector<10x16xf32>
    %93 = tpu.matmul %79, %92, %cst_61 {dimension_numbers = #tpu.dot_dimension_numbers<[1], [0], [0], [1], [0, 0, 1, 1], [], []>} : vector<10x32xf32>, vector<32x16xf32>, vector<10x16xf32> -> vector<10x16xf32>
    %c976 = arith.constant 976 : index
    %c0_62 = arith.constant 0 : index
    %94 = vector.load %arg2[%c976, %c0_62] : memref<1328x96xf32, #tpu.memory_space<vmem>>, vector<1x16xf32>
    %95 = vector.broadcast %94 : vector<1x16xf32> to vector<10x16xf32>
    %96 = arith.addf %93, %95 : vector<10x16xf32>
    %cst_63 = arith.constant 0.000000e+00 : f32
    %97 = vector.broadcast %cst_63 : f32 to vector<10x16xf32>
    %98 = arith.maximumf %96, %97 : vector<10x16xf32>
    %c984 = arith.constant 984 : index
    %c0_64 = arith.constant 0 : index
    %99 = vector.load %arg2[%c984, %c0_64] : memref<1328x96xf32, #tpu.memory_space<vmem>>, vector<16x2xf32>
    %cst_65 = arith.constant dense<0.000000e+00> : vector<10x2xf32>
    %100 = tpu.matmul %98, %99, %cst_65 {dimension_numbers = #tpu.dot_dimension_numbers<[1], [0], [0], [1], [0, 0, 1, 1], [], []>} : vector<10x16xf32>, vector<16x2xf32>, vector<10x2xf32> -> vector<10x2xf32>
    %101 = arith.addf %91, %100 : vector<10x2xf32>
    %c1000 = arith.constant 1000 : index
    %c0_66 = arith.constant 0 : index
    %102 = vector.load %arg2[%c1000, %c0_66] : memref<1328x96xf32, #tpu.memory_space<vmem>>, vector<1x2xf32>
    %103 = vector.broadcast %102 : vector<1x2xf32> to vector<10x2xf32>
    %104 = arith.addf %101, %103 : vector<10x2xf32>
    %c0_67 = arith.constant 0 : index
    %c0_68 = arith.constant 0 : index
    %105 = vector.load %arg3[%c0_67, %c0_68] : memref<10x2xf32, #tpu.memory_space<vmem>>, vector<10x2xf32>
    tpu.vector_store %arg3[%c0_67, %c0_68], %104 {strides = array<i32>} : memref<10x2xf32, #tpu.memory_space<vmem>>, vector<10x2xf32>,
    %c1008 = arith.constant 1008 : index
    %c0_69 = arith.constant 0 : index
    %106 = vector.load %arg2[%c1008, %c0_69] : memref<1328x96xf32, #tpu.memory_space<vmem>>, vector<32x16xf32>
    %cst_70 = arith.constant dense<0.000000e+00> : vector<6x16xf32>
    %107 = tpu.matmul %46, %106, %cst_70 {dimension_numbers = #tpu.dot_dimension_numbers<[1], [0], [0], [1], [0, 0, 1, 1], [], []>} : vector<6x32xf32>, vector<32x16xf32>, vector<6x16xf32> -> vector<6x16xf32>
    %c1040 = arith.constant 1040 : index
    %c0_71 = arith.constant 0 : index
    %108 = vector.load %arg2[%c1040, %c0_71] : memref<1328x96xf32, #tpu.memory_space<vmem>>, vector<1x16xf32>
    %109 = vector.broadcast %108 : vector<1x16xf32> to vector<6x16xf32>
    %110 = arith.addf %107, %109 : vector<6x16xf32>
    %cst_72 = arith.constant 0.000000e+00 : f32
    %111 = vector.broadcast %cst_72 : f32 to vector<6x16xf32>
    %112 = arith.maximumf %110, %111 : vector<6x16xf32>
    %c1048 = arith.constant 1048 : index
    %c0_73 = arith.constant 0 : index
    %113 = vector.load %arg2[%c1048, %c0_73] : memref<1328x96xf32, #tpu.memory_space<vmem>>, vector<16x2xf32>
    %cst_74 = arith.constant dense<0.000000e+00> : vector<6x2xf32>
    %114 = tpu.matmul %112, %113, %cst_74 {dimension_numbers = #tpu.dot_dimension_numbers<[1], [0], [0], [1], [0, 0, 1, 1], [], []>} : vector<6x16xf32>, vector<16x2xf32>, vector<6x2xf32> -> vector<6x2xf32>
    %c1064 = arith.constant 1064 : index
    %c0_75 = arith.constant 0 : index
    %115 = vector.load %arg2[%c1064, %c0_75] : memref<1328x96xf32, #tpu.memory_space<vmem>>, vector<32x16xf32>
    %cst_76 = arith.constant dense<0.000000e+00> : vector<6x16xf32>
    %116 = tpu.matmul %82, %115, %cst_76 {dimension_numbers = #tpu.dot_dimension_numbers<[1], [0], [0], [1], [0, 0, 1, 1], [], []>} : vector<6x32xf32>, vector<32x16xf32>, vector<6x16xf32> -> vector<6x16xf32>
    %c1096 = arith.constant 1096 : index
    %c0_77 = arith.constant 0 : index
    %117 = vector.load %arg2[%c1096, %c0_77] : memref<1328x96xf32, #tpu.memory_space<vmem>>, vector<1x16xf32>
    %118 = vector.broadcast %117 : vector<1x16xf32> to vector<6x16xf32>
    %119 = arith.addf %116, %118 : vector<6x16xf32>
    %cst_78 = arith.constant 0.000000e+00 : f32
    %120 = vector.broadcast %cst_78 : f32 to vector<6x16xf32>
    %121 = arith.maximumf %119, %120 : vector<6x16xf32>
    %c1104 = arith.constant 1104 : index
    %c0_79 = arith.constant 0 : index
    %122 = vector.load %arg2[%c1104, %c0_79] : memref<1328x96xf32, #tpu.memory_space<vmem>>, vector<16x2xf32>
    %cst_80 = arith.constant dense<0.000000e+00> : vector<6x2xf32>
    %123 = tpu.matmul %121, %122, %cst_80 {dimension_numbers = #tpu.dot_dimension_numbers<[1], [0], [0], [1], [0, 0, 1, 1], [], []>} : vector<6x16xf32>, vector<16x2xf32>, vector<6x2xf32> -> vector<6x2xf32>
    %124 = arith.addf %114, %123 : vector<6x2xf32>
    %c1120 = arith.constant 1120 : index
    %c0_81 = arith.constant 0 : index
    %125 = vector.load %arg2[%c1120, %c0_81] : memref<1328x96xf32, #tpu.memory_space<vmem>>, vector<1x2xf32>
    %126 = vector.broadcast %125 : vector<1x2xf32> to vector<6x2xf32>
    %127 = arith.addf %124, %126 : vector<6x2xf32>
    %c0_82 = arith.constant 0 : index
    %c0_83 = arith.constant 0 : index
    %128 = vector.load %arg4[%c0_82, %c0_83] : memref<6x2xf32, #tpu.memory_space<vmem>>, vector<6x2xf32>
    tpu.vector_store %arg4[%c0_82, %c0_83], %127 {strides = array<i32>} : memref<6x2xf32, #tpu.memory_space<vmem>>, vector<6x2xf32>,
    return
  }
}

</mosaic_0001>

<bundles_post_ra>
// kernel: forward.1
= control target key start
LH: loop header
LB: loop body
LE: loop exit
PB: predicated region body
PF: predicated region fallthrough
CT: control target
= control target key end

     0   :  { %vm42_vm0 = vcmask 1043456   ;;  %vm32_vm1 = vcmask 31744   ;;  %v3610_v0 = vmov 0.0   ;;  %vm3611_vm2 = vmmov 0   ;;  %s4647_s2 = inlined_call_operand.vmem [shape: f32[1328,96], index: 2, kind: input, shape index: {}]   ;;  %s4648_s0 = inlined_call_operand.vmem [shape: f32[18,4], index: 0, kind: input, shape index: {}]   ;;  %s4649_s1 = inlined_call_operand.vmem [shape: f32[72,1], index: 1, kind: input, shape index: {}]   ;;  %s4650_s3 = inlined_call_operand.vmem [shape: f32[10,2], index: 3, kind: output, shape index: {0}]   ;;  %s4651_s4 = inlined_call_operand.vmem [shape: f32[6,2], index: 4, kind: output, shape index: {1}]  }
   0x1   :  { %2940 = vmatprep.subr.mxu1 %v3610_v0  ;;  %v28_v1 = vld [vmem:[%s4647_s2] sm:$0xf]  ;;  %2942 = vmatprep.mubr.msk.f32.mxu1 %vm3611_vm2, %v3610_v0  ;;  %v135_v3 = vld [vmem:[%s4647_s2 + $0x8] sm:$0xff]  ;;  %v136_v4 = vld [vmem:[%s4647_s2 + $0x10] sm:$0xff]  ;;  %v3612_v5 = vmov 0.0|0.0   ;;  %vm144_vm3 = vcmask 392192  }
   0x2   :  { %v16_v2 = vld [vmem:[%s4648_s0] sm:$0xff]  ;;  %2941 = vmatpush3.msk.msra.mxu1 %vm42_vm0, %v28_v1  ;;  %3422 = vmatprep.subr.bf16.mxu0 %v3612_v5  ;;  %v3414_v6 = vpack.c.bf16 %v136_v4, %v135_v3  ;;  %v17_v7 = vld [vmem:[%s4648_s0 + $0x8] sm:$0xff]  ;;  %v18_v8 = vld [vmem:[%s4648_s0 + $0x10] sm:$0x3]  ;;  %v3613_v36 = vmov 0   ;;  %vm352_vm4 = vcmask 1041408  }
   0x3   :  { %2943 = vmatmul.mubr.msk.f32.vlgmr.msra.gmra.mrb[0].mxu1 %vm32_vm1, %v16_v2  ;;  %3413 = vmatprep.subr.bf16.mxu1 %v3612_v5  ;;  %v137_v9 = vld [vmem:[%s4647_s2 + $0x18] sm:$0xff]  ;;  %v138_v10 = vld [vmem:[%s4647_s2 + $0x20] sm:$0xff]  ;;  %v139_v12 = vld [vmem:[%s4647_s2 + $0x28] sm:$0xff]  ;;  %vm324_vm5 = vcmask 146432   ;;  %vm493_vm6 = vcmask 588800   ;;  %vm713_vm7 = vcmask 261120  }
   0x4   :  { %2945 = vmatprep.mubr.msk.f32.mxu1 %vm3611_vm2, %v3610_v0  ;;  %2978 = vmatprep.mubr.msk.f32.mxu0 %vm3611_vm2, %v3610_v0  ;;  %v3417_v11 = vpack.c.bf16 %v138_v10, %v137_v9  ;;  %v140_v13 = vld [vmem:[%s4647_s2 + $0x30] sm:$0xff]  ;;  %v129_v19 = vld [vmem:[%s4647_s2 + $0x38] sm:$0xff]  ;;  %v130_v26 = vld [vmem:[%s4647_s2 + $0x40] sm:$0xff]  ;;  %vm841_vm8 = vcmask 785408   ;;  %vm949_vm9 = vcmask 293888   ;;  %vm2130_vm10 = vcmask 130048  }
   0x5   :  { %3415 = vmatpush3.bf16.msra.mxu1 %v3414_v6  ;;  %v3420_v14 = vpack.c.bf16 %v140_v13, %v139_v12  ;;  %v29_v15 = vld [vmem:[%s4647_s2 + $0x50] sm:$0xff]  ;;  %v30_v20 = vld [vmem:[%s4647_s2 + $0x58] sm:$0xff]  ;;  %v31_v27 = vld [vmem:[%s4647_s2 + $0x60] sm:$0x3]  ;;  %3608 = vset.pattern.permute.xlu0 %v3613_v36  ;;  %vm2302_vm11 = vcmask 9216   ;;  %vm2300_vm12 = vcmask 15360  }
   0x6   :  { %3416 = vmatprep.subr.bf16.mxu1 %v3612_v5  ;;  %v131_v33 = vld [vmem:[%s4647_s2 + $0x48] sm:$0x3]  ;;  %v19_v37 = vld [vmem:[%s4649_s1] sm:$0xff]  ;;  %3609 = vset.pattern.permute.xlu1 %v3613_v36  ;;  %v21_v38 = vld [vmem:[%s4649_s1 + $0x10] sm:$0xff]  ;;  %vm2626_vm13 = vcmask 13312  }
   0x7   :  { %2946 = vmatmul.mubr.msk.f32.gmra.mrb[2].mxu1 %vm32_vm1, %v17_v7  ;;  %272 = vperm.xlu0 %3608, %v19_v37   ;;  %v20_v39 = vld [vmem:[%s4649_s1 + $0x8] sm:$0xff]  ;;  %v22_v40 = vld [vmem:[%s4649_s1 + $0x18] sm:$0xff]  ;;  %v23_v41 = vld [vmem:[%s4649_s1 + $0x20] sm:$0xff] }
   0x8   :  { %2948 = vmatprep.mubr.msk.f32.mxu1 %vm3611_vm2, %v3610_v0  ;;  %282 = vperm.xlu1 %3609, %v21_v38   ;;  %v24_v42 = vld [vmem:[%s4649_s1 + $0x28] sm:$0xff]  ;;  %v25_v43 = vld [vmem:[%s4649_s1 + $0x30] sm:$0xff]  ;;  %v26_v44 = vld [vmem:[%s4649_s1 + $0x38] sm:$0xff] }
   0x9   :  { %3418 = vmatpush3.bf16.msra.mxu1 %v3417_v11  ;;  %v27_v45 = vld [vmem:[%s4649_s1 + $0x40] sm:$0xff]  ;;  %v141_v48 = vld [vmem:[%s4647_s2 + $0x68] sm:$0xff]  ;;  %v142_v49 = vld [vmem:[%s4647_s2 + $0x70] sm:$0xff] }
   0xa   :  { %3419 = vmatprep.subr.bf16.mxu1 %v3612_v5  ;;  %v143_v54 = vld [vmem:[%s4647_s2 + $0x78] sm:$0x3]  ;;  %v3767_v59 = vld [vmem:[%s4647_s2 + $0x468] sm:$0xff]  ;;  %v3779_v60 = vld [vmem:[%s4647_s2 + $0x470] sm:$0xff] }
   0xb   :  { %2949 = vmatmul.mubr.msk.f32.gmra.mrb[4].mxu1 %vm32_vm1, %v18_v8  ;;  %277 = vperm.xlu0 %3608, %v20_v39   ;;  %v3788_v61 = vld [vmem:[%s4647_s2 + $0x478] sm:$0xff]  ;;  %v3797_v62 = vld [vmem:[%s4647_s2 + $0x480] sm:$0xff]  ;;  %v3806_v63 = vld [vmem:[%s4647_s2 + $0x488] sm:$0xff] }
   0xc   :  { %2963 = vmatprep.mubr.msk.f32.mxu1 %vm3611_vm2, %v3610_v0  ;;  %287 = vperm.xlu1 %3609, %v22_v40   ;;  %v3815_v1 = vld [vmem:[%s4647_s2 + $0x490] sm:$0xff]  ;;  %v3824_v2 = vld [vmem:[%s4647_s2 + $0x498] sm:$0xff]  ;;  %v3833_v3 = vld [vmem:[%s4647_s2 + $0x4a0] sm:$0xff] }
   0xd   :  { %3421 = vmatpush3.bf16.msra.mxu1 %v3420_v14  ;;  %v3842_v4 = vld [vmem:[%s4647_s2 + $0x4a8] sm:$0xff]  ;;  %v704_v6 = vld [vmem:[%s4647_s2 + $0x138] sm:$0xff]  ;;  %v705_v7 = vld [vmem:[%s4647_s2 + $0x140] sm:$0xff] }
   0xe   :  { %3425 = vmatprep.subr.bf16.mxu1 %v3612_v5  ;;  %v706_v8 = vld [vmem:[%s4647_s2 + $0x148] sm:$0xff]  ;;  %v3441_v9 = vpack.c.bf16 %v705_v7, %v704_v6  ;;  %v707_v10 = vld [vmem:[%s4647_s2 + $0x150] sm:$0xff]  ;;  %v468_v39 = vld [vmem:[%s4647_s2 + $0x100] sm:$0xff] }
   0xf   :  { %292 = vperm.xlu0 %3608, %v23_v41   ;;  %v3444_v11 = vpack.c.bf16 %v707_v10, %v706_v8  ;;  %v261_v12 = vld [vmem:[%s4647_s2 + $0xa8] sm:$0xff]  ;;  %v470_v8 = vld [vmem:[%s4647_s2 + $0x110] sm:$0xff] }
  0x10   :  { %297 = vperm.xlu1 %3609, %v24_v42   ;;  %v265_v41 = vld [vmem:[%s4647_s2 + $0xc8] sm:$0xff] }
  0x13   :  { %302 = vperm.xlu0 %3608, %v25_v43   ;;  %v469_v43 = vld [vmem:[%s4647_s2 + $0x108] sm:$0xff] }
  0x14   :  { %307 = vperm.xlu1 %3609, %v26_v44  }
  0x17   :  { %312 = vperm.xlu0 %3608, %v27_v45  }
  0x86   :  { %v3865_v13 = vpop.permute.xlu0 %272 }
  0x87   :  { %v315_v14 = vmul.f32 %v3865_v13, %v261_v12 }
  0xd6   :  { %v112_v16 = vpop.f32.mrb[0].mxu1 }
  0xd7   :  { %v113_v17 = vadd.f32 %v112_v16, %v29_v15  ;;  %v2944_v18 = vpop.f32.mrb[1].mxu1  ;;  %v262_v15 = vld [vmem:[%s4647_s2 + $0xb0] sm:$0xff]  ;;  %v3871_v16 = vpop.permute.xlu0 %277 }
  0xd8   :  { %v316_v18 = vmul.f32 %v3871_v16, %v262_v15 }
  0xd9   :  { %v126_v21 = vmax.f32 %v113_v17, 0.0 }
  0xda   :  { %v117_v22 = vpop.f32.mrb[2].mxu1 }
  0xdb   :  { %v132_v23 = vmul.f32 %v129_v19, %v126_v21  ;;  %v118_v24 = vadd.f32 %v117_v22, %v30_v20  ;;  %v2947_v25 = vpop.f32.mrb[3].mxu1  ;;  %v466_v21 = vld [vmem:[%s4647_s2 + $0xf0] sm:$0xff]  ;;  %v263_v22 = vld [vmem:[%s4647_s2 + $0xb8] sm:$0xff] }
  0xdc   :  { %v467_v25 = vld [vmem:[%s4647_s2 + $0xf8] sm:$0xff] }
  0xdd   :  { %v127_v28 = vmax.f32 %v118_v24, 0.0  ;;  %2964 = vmatmul.mubr.msk.f32.vlgmr.msra.gmra.mrb[6].mxu1 %vm144_vm3, %v132_v23  ;;  %v3880_v23 = vpop.permute.xlu1 %282 }
  0xde   :  { %v122_v29 = vpop.f32.mrb[4].mxu1  ;;  %2966 = vmatprep.mubr.msk.f32.mxu1 %vm3611_vm2, %v3610_v0 }
  0xdf   :  { %v133_v30 = vmul.f32 %v130_v26, %v127_v28  ;;  %v123_v31 = vadd.f32 %v122_v29, %v31_v27  ;;  %v2950_v32 = vpop.f32.mrb[5].mxu1  ;;  %v317_v27 = vmul.f32 %v3880_v23, %v263_v22  ;;  %v268_v22 = vld [vmem:[%s4647_s2 + $0xe0] sm:$0xff] }
  0xe1   :  { %v128_v34 = vmax.f32 %v123_v31, 0.0  ;;  %2967 = vmatmul.mubr.msk.f32.gmra.mrb[8].mxu1 %vm144_vm3, %v133_v30  ;;  %v264_v30 = vld [vmem:[%s4647_s2 + $0xc0] sm:$0xff]  ;;  %v3889_v32 = vpop.permute.xlu1 %287 }
  0xe2   :  { %2969 = vmatprep.mubr.msk.f32.mxu1 %vm3611_vm2, %v3610_v0  ;;  %v318_v36 = vmul.f32 %v3889_v32, %v264_v30  ;;  %v472_v30 = vld [vmem:[%s4647_s2 + $0x120] sm:$0xff] }
  0xe3   :  { %v134_v35 = vmul.f32 %v131_v33, %v128_v34 }
  0xe5   :  { %2970 = vmatmul.mubr.msk.f32.gmra.mrb[10].mxu1 %vm144_vm3, %v134_v35  ;;  %v3908_v7 = vpop.permute.xlu1 %297 }
  0xe6   :  { %3023 = vmatprep.mubr.msk.f32.mxu1 %vm3611_vm2, %v3610_v0 }
 0x1b0   :  { %v220_v46 = vpop.f32.mrb[6].mxu1 }
 0x1b1   :  { %v2965_v47 = vpop.f32.mrb[7].mxu1  ;;  %v3749_v51 = vadd.f32 %v220_v46, %v141_v48 }
 0x1b2   :  { %v3901_v47 = vpop.permute.xlu0 %292 }
 0x1b3   :  { %v319_v48 = vmul.f32 %v3901_v47, %v265_v41 }
 0x1b4   :  { %v225_v50 = vpop.f32.mrb[8].mxu1 }
 0x1b5   :  { %v3751_v52 = vadd.f32 %v225_v50, %v142_v49  ;;  %v2968_v53 = vpop.f32.mrb[9].mxu1  ;;  %v266_v50 = vld [vmem:[%s4647_s2 + $0xd0] sm:$0xff] }
 0x1b7   :  { %v3758_v55 = vpack.c.bf16 %v3751_v52, %v3749_v51 }
 0x1b8   :  { %v230_v56 = vpop.f32.mrb[10].mxu1 }
 0x1b9   :  { %v3760_v57 = vadd.f32 %v230_v56, %v143_v54  ;;  %3424 = vmatpush3.bf16.msra.mxu0 %v3758_v55  ;;  %v2971_v58 = vpop.f32.mrb[11].mxu1 }
 0x1ba   :  { %2976 = vmatprep.subr.mxu0 %v3610_v0 }
 0x1bd   :  { %2977 = vmatpush3.msk.msra.mxu0 %vm352_vm4, %v3760_v57 }
 0x1be   :  { %2979 = vmatmul.mubr.msk.f32.vlgmr.msra.gmra.mrb[0].mxu0 %vm324_vm5, %v3767_v59  ;;  %3440 = vmatprep.subr.bf16.mxu0 %v3612_v5 }
 0x1bf   :  { %2981 = vmatprep.mubr.msk.f32.mxu0 %vm3611_vm2, %v3610_v0  ;;  %3442 = vmatpush3.bf16.msra.mxu0 %v3441_v9  ;;  %v320_v9 = vmul.f32 %v3908_v7, %v266_v50 }
 0x1c0   :  { %3443 = vmatprep.subr.bf16.mxu0 %v3612_v5 }
 0x1c2   :  { %2982 = vmatmul.mubr.msk.f32.gmra.mrb[2].mxu0 %vm324_vm5, %v3779_v60 }
 0x1c3   :  { %2984 = vmatprep.mubr.msk.f32.mxu0 %vm3611_vm2, %v3610_v0  ;;  %3445 = vmatpush3.bf16.msra.mxu0 %v3444_v11  ;;  %v267_v11 = vld [vmem:[%s4647_s2 + $0xd8] sm:$0xff] }
 0x1c4   :  { %3446 = vmatprep.subr.bf16.mxu0 %v3612_v5 }
 0x1c6   :  { %2985 = vmatmul.mubr.msk.f32.gmra.mrb[4].mxu0 %vm324_vm5, %v3788_v61 }
 0x1c7   :  { %2987 = vmatprep.mubr.msk.f32.mxu0 %vm3611_vm2, %v3610_v0 }
 0x1ca   :  { %2988 = vmatmul.mubr.msk.f32.gmra.mrb[6].mxu0 %vm324_vm5, %v3797_v62 }
 0x1cb   :  { %2990 = vmatprep.mubr.msk.f32.mxu0 %vm3611_vm2, %v3610_v0 }
 0x1ce   :  { %2991 = vmatmul.mubr.msk.f32.gmra.mrb[8].mxu0 %vm324_vm5, %v3806_v63 }
 0x1cf   :  { %2993 = vmatprep.mubr.msk.f32.mxu0 %vm3611_vm2, %v3610_v0 }
 0x1d2   :  { %2994 = vmatmul.mubr.msk.f32.gmra.mrb[10].mxu0 %vm324_vm5, %v3815_v1 }
 0x1d3   :  { %2996 = vmatprep.mubr.msk.f32.mxu0 %vm3611_vm2, %v3610_v0 }
 0x1d6   :  { %2997 = vmatmul.mubr.msk.f32.gmra.mrb[12].mxu0 %vm324_vm5, %v3824_v2 }
 0x1d7   :  { %2999 = vmatprep.mubr.msk.f32.mxu0 %vm3611_vm2, %v3610_v0 }
 0x1da   :  { %3000 = vmatmul.mubr.msk.f32.gmra.mrb[14].mxu0 %vm324_vm5, %v3833_v3 }
 0x1db   :  { %3002 = vmatprep.mubr.msk.f32.mxu0 %vm3611_vm2, %v3610_v0 }
 0x1de   :  { %3003 = vmatmul.mubr.msk.f32.gmra.mrb[16].mxu0 %vm324_vm5, %v3842_v4 }
 0x1df   :  { %3067 = vmatprep.mubr.msk.f32.mxu0 %vm3611_vm2, %v3610_v0 }
 0x291   :  { %v422_v17 = vpop.f32.mrb[0].mxu0 }
 0x292   :  { %v423_v19 = vadd.f32 %v422_v17, %v315_v14  ;;  %v2980_v20 = vpop.f32.mrb[1].mxu0  ;;  %v471_v14 = vld [vmem:[%s4647_s2 + $0x118] sm:$0xff] }
 0x294   :  { %v475_v26 = vadd.f32 %v466_v21, %v423_v19  ;;  %v3920_v19 = vpop.permute.xlu0 %302 }
 0x295   :  { %v427_v24 = vpop.f32.mrb[2].mxu0  ;;  %v321_v20 = vmul.f32 %v3920_v19, %v267_v11  ;;  %v4018_v11 = vld [vmem:[%s4647_s2 + $0x4e8] sm:$0xff] }
 0x296   :  { %v428_v28 = vadd.f32 %v427_v24, %v316_v18  ;;  %v2983_v29 = vpop.f32.mrb[3].mxu0  ;;  %v484_v34 = vmax.f32 %v475_v26, 0.0  ;;  %v3927_v24 = vpop.permute.xlu1 %307 }
 0x298   :  { %v476_v31 = vadd.f32 %v467_v25, %v428_v28 }
 0x299   :  { %v432_v33 = vpop.f32.mrb[4].mxu0 }
 0x29a   :  { %v485_v35 = vmax.f32 %v476_v31, 0.0  ;;  %v433_v37 = vadd.f32 %v432_v33, %v317_v27  ;;  %v2986_v38 = vpop.f32.mrb[5].mxu0  ;;  %v322_v31 = vmul.f32 %v3927_v24, %v268_v22 }
 0x29c   :  { %v3426_v40 = vpack.c.bf16 %v485_v35, %v484_v34  ;;  %v477_v44 = vadd.f32 %v468_v39, %v433_v37  ;;  %v269_v34 = vld [vmem:[%s4647_s2 + $0xe8] sm:$0xff]  ;;  %v3936_v35 = vpop.permute.xlu0 %312 }
 0x29d   :  { %v437_v42 = vpop.f32.mrb[6].mxu0  ;;  %v473_v37 = vld [vmem:[%s4647_s2 + $0x128] sm:$0xff]  ;;  %v323_v41 = vmul.f32 %v3936_v35, %v269_v34  ;;  %v836_v34 = vld [vmem:[%s4647_s2 + $0x1b8] sm:$0xff] }
 0x29e   :  { %v438_v45 = vadd.f32 %v437_v42, %v318_v36  ;;  %v2989_v46 = vpop.f32.mrb[7].mxu0  ;;  %3427 = vmatpush3.bf16.msra.mxu1 %v3426_v40  ;;  %v486_v54 = vmax.f32 %v477_v44, 0.0  ;;  %v474_v44 = vld [vmem:[%s4647_s2 + $0x130] sm:$0xff] }
 0x29f   :  { %3428 = vmatprep.subr.bf16.mxu1 %v3612_v5 }
 0x2a0   :  { %v478_v49 = vadd.f32 %v469_v43, %v438_v45 }
 0x2a1   :  { %v442_v53 = vpop.f32.mrb[8].mxu0 }
 0x2a2   :  { %v487_v56 = vmax.f32 %v478_v49, 0.0  ;;  %v443_v58 = vadd.f32 %v442_v53, %v319_v48  ;;  %v2992_v6 = vpop.f32.mrb[9].mxu0 }
 0x2a3   :  { %v3982_v6 = vld [vmem:[%s4647_s2 + $0x4c8] sm:$0xff] }
 0x2a4   :  { %v3429_v10 = vpack.c.bf16 %v487_v56, %v486_v54  ;;  %v479_v15 = vadd.f32 %v470_v8, %v443_v58  ;;  %v3950_v56 = vld [vmem:[%s4647_s2 + $0x4b0] sm:$0xff]  ;;  %v3961_v58 = vld [vmem:[%s4647_s2 + $0x4b8] sm:$0xff] }
 0x2a5   :  { %v447_v12 = vpop.f32.mrb[10].mxu0  ;;  %v3991_v8 = vld [vmem:[%s4647_s2 + $0x4d0] sm:$0xf] }
 0x2a6   :  { %v448_v17 = vadd.f32 %v447_v12, %v320_v9  ;;  %v2995_v18 = vpop.f32.mrb[11].mxu0  ;;  %3430 = vmatpush3.bf16.msra.mxu1 %v3429_v10  ;;  %v488_v26 = vmax.f32 %v479_v15, 0.0  ;;  %v4000_v9 = vld [vmem:[%s4647_s2 + $0x4d8] sm:$0xff]  ;;  %v4009_v10 = vld [vmem:[%s4647_s2 + $0x4e0] sm:$0xff]  ;;  %v4027_v12 = vld [vmem:[%s4647_s2 + $0x4f0] sm:$0xff] }
 0x2a7   :  { %3431 = vmatprep.subr.bf16.mxu1 %v3612_v5  ;;  %v829_v15 = vld [vmem:[%s4647_s2 + $0x180] sm:$0xff] }
 0x2a8   :  { %v480_v21 = vadd.f32 %v471_v14, %v448_v17  ;;  %v4036_v14 = vld [vmem:[%s4647_s2 + $0x4f8] sm:$0xf]  ;;  %v830_v17 = vld [vmem:[%s4647_s2 + $0x188] sm:$0xff] }
 0x2a9   :  { %v452_v25 = vpop.f32.mrb[12].mxu0  ;;  %v3447_v18 = vpack.c.bf16 %v830_v17, %v829_v15  ;;  %v4103_v17 = vld [vmem:[%s4647_s2 + $0x80] sm:$0xff] }
 0x2aa   :  { %v489_v27 = vmax.f32 %v480_v21, 0.0  ;;  %v453_v28 = vadd.f32 %v452_v25, %v321_v20  ;;  %v2998_v29 = vpop.f32.mrb[13].mxu0  ;;  %v831_v20 = vld [vmem:[%s4647_s2 + $0x190] sm:$0xff]  ;;  %v832_v21 = vld [vmem:[%s4647_s2 + $0x198] sm:$0xff] }
 0x2ac   :  { %v3432_v33 = vpack.c.bf16 %v489_v27, %v488_v26  ;;  %v481_v38 = vadd.f32 %v472_v30, %v453_v28  ;;  %v3450_v26 = vpack.c.bf16 %v832_v21, %v831_v20  ;;  %v833_v27 = vld [vmem:[%s4647_s2 + $0x1a0] sm:$0xff]  ;;  %v834_v28 = vld [vmem:[%s4647_s2 + $0x1a8] sm:$0xff] }
 0x2ad   :  { %v457_v36 = vpop.f32.mrb[14].mxu0 }
 0x2ae   :  { %v458_v39 = vadd.f32 %v457_v36, %v322_v31  ;;  %v3001_v40 = vpop.f32.mrb[15].mxu0  ;;  %3433 = vmatpush3.bf16.msra.mxu1 %v3432_v33  ;;  %v490_v45 = vmax.f32 %v481_v38, 0.0  ;;  %v3453_v31 = vpack.c.bf16 %v834_v28, %v833_v27  ;;  %v835_v33 = vld [vmem:[%s4647_s2 + $0x1b0] sm:$0xff]  ;;  %v4112_v27 = vld [vmem:[%s4647_s2 + $0x88] sm:$0xff] }
 0x2af   :  { %3434 = vmatprep.subr.bf16.mxu1 %v3612_v5  ;;  %v3456_v38 = vpack.c.bf16 %v836_v34, %v835_v33  ;;  %v710_v28 = vld [vmem:[%s4647_s2 + $0x168] sm:$0xff] }
 0x2b0   :  { %v482_v42 = vadd.f32 %v473_v37, %v458_v39 }
 0x2b1   :  { %v462_v43 = vpop.f32.mrb[16].mxu0 }
 0x2b2   :  { %v491_v46 = vmax.f32 %v482_v42, 0.0  ;;  %v463_v48 = vadd.f32 %v462_v43, %v323_v41  ;;  %v3004_v49 = vpop.f32.mrb[17].mxu0  ;;  %v837_v43 = vld [vmem:[%s4647_s2 + $0x1c0] sm:$0xff] }
 0x2b4   :  { %v3435_v50 = vpack.c.bf16 %v491_v46, %v490_v45  ;;  %v483_v53 = vadd.f32 %v474_v44, %v463_v48  ;;  %v838_v44 = vld [vmem:[%s4647_s2 + $0x1c8] sm:$0xff]  ;;  %v839_v46 = vld [vmem:[%s4647_s2 + $0x1d0] sm:$0xff]  ;;  %v840_v48 = vld [vmem:[%s4647_s2 + $0x1d8] sm:$0xff] }
 0x2b5   :  { %v3459_v45 = vpack.c.bf16 %v838_v44, %v837_v43  ;;  %v3462_v49 = vpack.c.bf16 %v840_v48, %v839_v46  ;;  %v4136_v43 = vld [vmem:[%s4647_s2 + $0x98] sm:$0xff] }
 0x2b6   :  { %3436 = vmatpush3.bf16.msra.mxu1 %v3435_v50  ;;  %v492_v54 = vmax.f32 %v483_v53, 0.0  ;;  %v708_v50 = vld [vmem:[%s4647_s2 + $0x158] sm:$0xff] }
 0x2b7   :  { %3021 = vmatprep.subr.mxu1 %v3610_v0  ;;  %v712_v44 = vld [vmem:[%s4647_s2 + $0x178] sm:$0xf] }
 0x2ba   :  { %3022 = vmatpush3.msra.mxu1 %v492_v54 }
 0x2bb   :  { %3024 = vmatmul.mubr.msk.f32.vlgmr.msra.gmra.mrb[12].mxu1 %vm493_vm6, %v3950_v56  ;;  %3437 = vmatprep.subr.bf16.mxu1 %v3612_v5 }
 0x2bc   :  { %3439 = vmatpush3.bf16.msra.mxu1 %v3758_v55  ;;  %3026 = vmatprep.mubr.msk.f32.mxu1 %vm3611_vm2, %v3610_v0  ;;  %v3973_v55 = vld [vmem:[%s4647_s2 + $0x4c0] sm:$0xff] }
 0x2bd   :  { %3042 = vmatprep.subr.mxu1 %v3610_v0 }
 0x2bf   :  { %3027 = vmatmul.mubr.msk.f32.gmra.mrb[14].mxu1 %vm493_vm6, %v3961_v58 }
 0x2c0   :  { %3043 = vmatpush3.msk.msra.mxu1 %vm352_vm4, %v3760_v57  ;;  %3029 = vmatprep.mubr.msk.f32.mxu1 %vm3611_vm2, %v3610_v0 }
 0x2c3   :  { %3030 = vmatmul.mubr.msk.f32.gmra.mrb[16].mxu1 %vm493_vm6, %v3973_v55 }
 0x2c4   :  { %3032 = vmatprep.mubr.msk.f32.mxu1 %vm3611_vm2, %v3610_v0 }
 0x2c7   :  { %3033 = vmatmul.mubr.msk.f32.gmra.mrb[18].mxu1 %vm493_vm6, %v3982_v6 }
 0x2c8   :  { %3035 = vmatprep.mubr.msk.f32.mxu1 %vm3611_vm2, %v3610_v0 }
 0x2cb   :  { %3036 = vmatmul.mubr.msk.f32.gmra.mrb[20].mxu1 %vm493_vm6, %v3991_v8 }
 0x2cc   :  { %3044 = vmatprep.mubr.msk.f32.mxu1 %vm3611_vm2, %v3610_v0 }
 0x2cf   :  { %3045 = vmatmul.mubr.msk.f32.vlgmr.msra.gmra.mrb[12].mxu1 %vm324_vm5, %v4000_v9 }
 0x2d0   :  { %3047 = vmatprep.mubr.msk.f32.mxu1 %vm3611_vm2, %v3610_v0 }
 0x2d3   :  { %3048 = vmatmul.mubr.msk.f32.gmra.mrb[14].mxu1 %vm324_vm5, %v4009_v10 }
 0x2d4   :  { %3050 = vmatprep.mubr.msk.f32.mxu1 %vm3611_vm2, %v3610_v0 }
 0x2d7   :  { %3051 = vmatmul.mubr.msk.f32.gmra.mrb[16].mxu1 %vm324_vm5, %v4018_v11 }
 0x2d8   :  { %3053 = vmatprep.mubr.msk.f32.mxu1 %vm3611_vm2, %v3610_v0 }
 0x2db   :  { %3054 = vmatmul.mubr.msk.f32.gmra.mrb[18].mxu1 %vm324_vm5, %v4027_v12 }
 0x2dc   :  { %3056 = vmatprep.mubr.msk.f32.mxu1 %vm3611_vm2, %v3610_v0 }
 0x2df   :  { %3057 = vmatmul.mubr.msk.f32.gmra.mrb[20].mxu1 %vm324_vm5, %v4036_v14 }
 0x3a2   :  { %v680_v22 = vpop.f32.mrb[12].mxu1 }
 0x3a3   :  { %v3046_v25 = vpop.f32.mrb[13].mxu1  ;;  %3068 = vmatmul.mubr.msk.f32.vlgmr.msra.gmra.mrb[18].mxu0 %vm713_vm7, %v680_v22 }
 0x3a4   :  { %3070 = vmatprep.mubr.msk.f32.mxu0 %vm3611_vm2, %v3610_v0  ;;  %3448 = vmatpush3.bf16.msra.mxu0 %v3447_v18  ;;  %v709_v18 = vld [vmem:[%s4647_s2 + $0x160] sm:$0xff] }
 0x3a5   :  { %3449 = vmatprep.subr.bf16.mxu0 %v3612_v5 }
 0x3a6   :  { %v685_v29 = vpop.f32.mrb[14].mxu1 }
 0x3a7   :  { %v3049_v30 = vpop.f32.mrb[15].mxu1  ;;  %3071 = vmatmul.mubr.msk.f32.gmra.mrb[20].mxu0 %vm713_vm7, %v685_v29 }
 0x3a8   :  { %3073 = vmatprep.mubr.msk.f32.mxu0 %vm3611_vm2, %v3610_v0  ;;  %3451 = vmatpush3.bf16.msra.mxu0 %v3450_v26 }
 0x3a9   :  { %3452 = vmatprep.subr.bf16.mxu0 %v3612_v5 }
 0x3aa   :  { %v690_v36 = vpop.f32.mrb[16].mxu1 }
 0x3ab   :  { %v3052_v37 = vpop.f32.mrb[17].mxu1  ;;  %3074 = vmatmul.mubr.msk.f32.gmra.mrb[22].mxu0 %vm713_vm7, %v690_v36  ;;  %v4124_v36 = vld [vmem:[%s4647_s2 + $0x90] sm:$0xff] }
 0x3ac   :  { %3076 = vmatprep.mubr.msk.f32.mxu0 %vm3611_vm2, %v3610_v0  ;;  %3454 = vmatpush3.bf16.msra.mxu0 %v3453_v31  ;;  %v711_v37 = vld [vmem:[%s4647_s2 + $0x170] sm:$0xff] }
 0x3ad   :  { %3455 = vmatprep.subr.bf16.mxu0 %v3612_v5 }
 0x3ae   :  { %v695_v39 = vpop.f32.mrb[18].mxu1 }
 0x3af   :  { %v3055_v40 = vpop.f32.mrb[19].mxu1  ;;  %3077 = vmatmul.mubr.msk.f32.gmra.mrb[24].mxu0 %vm713_vm7, %v695_v39 }
 0x3b0   :  { %3079 = vmatprep.mubr.msk.f32.mxu0 %vm3611_vm2, %v3610_v0  ;;  %3457 = vmatpush3.bf16.msra.mxu0 %v3456_v38 }
 0x3b1   :  { %3458 = vmatprep.subr.bf16.mxu0 %v3612_v5 }
 0x3b2   :  { %v700_v41 = vpop.f32.mrb[20].mxu1 }
 0x3b3   :  { %v3058_v42 = vpop.f32.mrb[21].mxu1  ;;  %3080 = vmatmul.mubr.msk.f32.gmra.mrb[26].mxu0 %vm713_vm7, %v700_v41 }
 0x3b4   :  { %3106 = vmatprep.mubr.msk.f32.mxu0 %vm3611_vm2, %v3610_v0  ;;  %3460 = vmatpush3.bf16.msra.mxu0 %v3459_v45 }
 0x3b5   :  { %3461 = vmatprep.subr.bf16.mxu0 %v3612_v5 }
 0x3b8   :  { %3463 = vmatpush3.bf16.msra.mxu0 %v3462_v49 }
 0x3b9   :  { %3484 = vmatprep.subr.bf16.mxu0 %v3612_v5 }
 0x476   :  { %v795_v53 = vpop.f32.mrb[18].mxu0 }
 0x477   :  { %v796_v54 = vadd.f32 %v795_v53, %v708_v50  ;;  %v3069_v15 = vpop.f32.mrb[19].mxu0  ;;  %v4148_v53 = vld [vmem:[%s4647_s2 + $0xa0] sm:$0xf] }
 0x479   :  { %v819_v20 = vmax.f32 %v796_v54, 0.0 }
 0x47a   :  { %v800_v21 = vpop.f32.mrb[20].mxu0 }
 0x47b   :  { %v824_v22 = vmul.f32 %v819_v20, %v4103_v17  ;;  %v801_v25 = vadd.f32 %v800_v21, %v709_v18  ;;  %v3072_v26 = vpop.f32.mrb[21].mxu0  ;;  %v4160_v18 = vld [vmem:[%s4647_s2 + $0x518] sm:$0xff] }
 0x47c   :  { %3131 = vmatprep.mubr.msk.f32.mxu1 %vm949_vm9, %v4160_v18 }
 0x47d   :  { %v820_v29 = vmax.f32 %v801_v25, 0.0  ;;  %3107 = vmatmul.mubr.msk.f32.vlgmr.msra.gmra.mrb[28].mxu0 %vm841_vm8, %v824_v22 }
 0x47e   :  { %v805_v30 = vpop.f32.mrb[22].mxu0  ;;  %3109 = vmatprep.mubr.msk.f32.mxu0 %vm3611_vm2, %v3610_v0 }
 0x47f   :  { %v825_v31 = vmul.f32 %v820_v29, %v4112_v27  ;;  %v806_v33 = vadd.f32 %v805_v30, %v710_v28  ;;  %v3075_v34 = vpop.f32.mrb[23].mxu0 }
 0x481   :  { %v821_v38 = vmax.f32 %v806_v33, 0.0  ;;  %3110 = vmatmul.mubr.msk.f32.gmra.mrb[30].mxu0 %vm841_vm8, %v825_v31 }
 0x482   :  { %v810_v39 = vpop.f32.mrb[24].mxu0  ;;  %3112 = vmatprep.mubr.msk.f32.mxu0 %vm3611_vm2, %v3610_v0 }
 0x483   :  { %v826_v40 = vmul.f32 %v821_v38, %v4124_v36  ;;  %v811_v41 = vadd.f32 %v810_v39, %v711_v37  ;;  %v3078_v42 = vpop.f32.mrb[25].mxu0  ;;  %v4168_v38 = vld [vmem:[%s4647_s2 + $0x520] sm:$0x3]  ;;  %v4181_v39 = vld [vmem:[%s4647_s2 + $0x528] sm:$0x3f] }
 0x484   :  { %v1110_v42 = vld [vmem:[%s4647_s2 + $0x510] sm:$0x3] }
 0x485   :  { %v822_v45 = vmax.f32 %v811_v41, 0.0  ;;  %3113 = vmatmul.mubr.msk.f32.gmra.mrb[32].mxu0 %vm841_vm8, %v826_v40  ;;  %v1108_v40 = vld [vmem:[%s4647_s2 + $0x500] sm:$0xff]  ;;  %v1109_v41 = vld [vmem:[%s4647_s2 + $0x508] sm:$0xff] }
 0x486   :  { %v815_v46 = vpop.f32.mrb[26].mxu0  ;;  %3115 = vmatprep.mubr.msk.f32.mxu0 %vm3611_vm2, %v3610_v0 }
 0x487   :  { %v827_v48 = vmul.f32 %v822_v45, %v4136_v43  ;;  %v816_v49 = vadd.f32 %v815_v46, %v712_v44  ;;  %v3081_v50 = vpop.f32.mrb[27].mxu0 }
 0x489   :  { %v823_v54 = vmax.f32 %v816_v49, 0.0  ;;  %3116 = vmatmul.mubr.msk.f32.gmra.mrb[34].mxu0 %vm841_vm8, %v827_v48  ;;  %v1111_v49 = vld [vmem:[%s4647_s2 + $0x1e0] sm:$0xff] }
 0x48a   :  { %3118 = vmatprep.mubr.msk.f32.mxu0 %vm3611_vm2, %v3610_v0 }
 0x48b   :  { %v828_v15 = vmul.f32 %v823_v54, %v4148_v53 }
 0x48d   :  { %3119 = vmatmul.mubr.msk.f32.gmra.mrb[36].mxu0 %vm841_vm8, %v828_v15 }
 0x48e   :  { %3172 = vmatprep.mubr.msk.f32.mxu0 %vm3611_vm2, %v3610_v0 }
 0x550   :  { %v923_v20 = vpop.f32.mrb[28].mxu0 }
 0x551   :  { %v3108_v21 = vpop.f32.mrb[29].mxu0 }
 0x554   :  { %v928_v22 = vpop.f32.mrb[30].mxu0 }
 0x555   :  { %v3464_v25 = vpack.c.bf16 %v928_v22, %v923_v20  ;;  %v3111_v26 = vpop.f32.mrb[31].mxu0  ;;  %v1112_v20 = vld [vmem:[%s4647_s2 + $0x1e8] sm:$0xff] }
 0x557   :  { %3465 = vmatprep.subr.bf16.mxu1 %v3464_v25 }
 0x558   :  { %v933_v28 = vpop.f32.mrb[32].mxu0  ;;  %3467 = vmatpush3.bf16.msra.mxu1 %v3464_v25 }
 0x559   :  { %v3114_v29 = vpop.f32.mrb[33].mxu0 }
 0x55c   :  { %v938_v30 = vpop.f32.mrb[34].mxu0 }
 0x55d   :  { %v3468_v31 = vpack.c.bf16 %v938_v30, %v933_v28  ;;  %v3117_v33 = vpop.f32.mrb[35].mxu0  ;;  %v1113_v28 = vld [vmem:[%s4647_s2 + $0x1f0] sm:$0x3] }
 0x55f   :  { %3469 = vmatprep.subr.bf16.mxu1 %v3468_v31 }
 0x560   :  { %v943_v34 = vpop.f32.mrb[36].mxu0  ;;  %3471 = vmatpush3.bf16.msra.mxu1 %v3468_v31 }
 0x561   :  { %v3120_v37 = vpop.f32.mrb[37].mxu0  ;;  %3129 = vmatprep.subr.msk.mxu1 %vm42_vm0, %v943_v34 }
 0x564   :  { %3130 = vmatpush3.msk.msra.mxu1 %vm42_vm0, %v943_v34 }
 0x565   :  { %3132 = vmatmul.mubr.msk.f32.vlgmr.msra.gmra.mrb[22].mxu1 %vm949_vm9, %v4168_v38  ;;  %3472 = vmatprep.subr.bf16.mxu1 %v3612_v5 }
 0x566   :  { %3474 = vmatpush3.bf16.msra.mxu1 %v3464_v25  ;;  %3144 = vmatprep.mubr.msk.f32.mxu1 %vm3611_vm2, %v3610_v0 }
 0x567   :  { %3475 = vmatprep.subr.bf16.mxu1 %v3612_v5 }
 0x56a   :  { %3477 = vmatpush3.bf16.msra.mxu1 %v3468_v31 }
 0x56b   :  { %3142 = vmatprep.subr.mxu1 %v3610_v0 }
 0x56e   :  { %3143 = vmatpush3.msk.msra.mxu1 %vm42_vm0, %v943_v34 }
 0x56f   :  { %3145 = vmatmul.mubr.msk.f32.vlgmr.msra.gmra.mrb[24].mxu1 %vm949_vm9, %v4181_v39  ;;  %3478 = vmatprep.subr.bf16.mxu1 %v3612_v5 }
 0x570   :  { %3480 = vmatpush3.bf16.msra.mxu1 %v3464_v25  ;;  %3157 = vmatprep.mubr.msk.f32.mxu1 %vm3611_vm2, %v3610_v0 }
 0x571   :  { %3481 = vmatprep.subr.bf16.mxu1 %v3612_v5 }
 0x574   :  { %3483 = vmatpush3.bf16.msra.mxu1 %v3468_v31 }
 0x575   :  { %3155 = vmatprep.subr.mxu1 %v3610_v0 }
 0x578   :  { %3156 = vmatpush3.msk.msra.mxu1 %vm42_vm0, %v943_v34 }
 0x579   :  { %3158 = vmatmul.mubr.msk.f32.vlgmr.msra.gmra.mrb[26].mxu1 %vm949_vm9, %v1108_v40  ;;  %3487 = vmatprep.subr.bf16.mxu1 %v3612_v5 }
 0x57a   :  { %3160 = vmatprep.mubr.msk.f32.mxu1 %vm3611_vm2, %v3610_v0 }
 0x57d   :  { %3161 = vmatmul.mubr.msk.f32.gmra.mrb[28].mxu1 %vm949_vm9, %v1109_v41 }
 0x57e   :  { %3163 = vmatprep.mubr.msk.f32.mxu1 %vm3611_vm2, %v3610_v0 }
 0x581   :  { %3164 = vmatmul.mubr.msk.f32.gmra.mrb[30].mxu1 %vm949_vm9, %v1110_v42 }
 0x582   :  { %3217 = vmatprep.mubr.msk.f32.mxu1 %vm3611_vm2, %v3610_v0 }
 0x638   :  { %v4211_v44 = vpop.f32.mrb[22].mxu1 }
 0x639   :  { %v4213_v45 = vpop.f32.mrb[23].mxu1 }
 0x642   :  { %v4215_v46 = vpop.f32.mrb[24].mxu1 }
 0x643   :  { %v3146_v48 = vpop.f32.mrb[25].mxu1 }
 0x64c   :  { %v1189_v50 = vpop.f32.mrb[26].mxu1 }
 0x64d   :  { %v1190_v54 = vadd.f32 %v1189_v50, %v1111_v49  ;;  %v3159_v15 = vpop.f32.mrb[27].mxu1 }
 0x64f   :  { %v1203_v21 = vmax.f32 %v1190_v54, 0.0  ;;  %v1343_v54 = vld [vmem:[%s4647_s2 + $0x258] sm:$0xff] }
 0x650   :  { %v1194_v22 = vpop.f32.mrb[28].mxu1 }
 0x651   :  { %v1195_v25 = vadd.f32 %v1194_v22, %v1112_v20  ;;  %v3162_v26 = vpop.f32.mrb[29].mxu1  ;;  %v1206_v29 = vadd.f32 %v1203_v21, %v3749_v51  ;;  %v1550_v51 = vld [vmem:[%s4647_s2 + $0x2a0] sm:$0xff] }
 0x652   :  { %v1214_v20 = vld [vmem:[%s4647_s2 + $0x220] sm:$0xff] }
 0x653   :  { %v1204_v30 = vmax.f32 %v1195_v25, 0.0  ;;  %v1209_v40 = vmul.f32 0.5, %v1206_v29 }
 0x654   :  { %v1199_v31 = vpop.f32.mrb[30].mxu1 }
 0x655   :  { %v1207_v33 = vadd.f32 %v1204_v30, %v3751_v52  ;;  %v1200_v34 = vadd.f32 %v1199_v31, %v1113_v28  ;;  %v3165_v37 = vpop.f32.mrb[31].mxu1  ;;  %v1551_v52 = vld [vmem:[%s4647_s2 + $0x2a8] sm:$0xff]  ;;  %v1223_v28 = vmul.f32 %v1214_v20, %v3880_v23  ;;  %v1216_v23 = vld [vmem:[%s4647_s2 + $0x230] sm:$0xff] }
 0x656   :  { %v1215_v30 = vld [vmem:[%s4647_s2 + $0x228] sm:$0xff] }
 0x657   :  { %v1210_v41 = vmul.f32 0.5, %v1207_v33  ;;  %v1205_v42 = vmax.f32 %v1200_v34, 0.0 }
 0x659   :  { %v4228_v48 = vpack.c.bf16 %v1210_v41, %v1209_v40  ;;  %v1208_v49 = vadd.f32 %v1205_v42, %v3760_v57  ;;  %v1552_v57 = vld [vmem:[%s4647_s2 + $0x2b0] sm:$0xff]  ;;  %v1345_v40 = vld [vmem:[%s4647_s2 + $0x268] sm:$0xff]  ;;  %v1224_v41 = vmul.f32 %v1215_v30, %v3889_v32  ;;  %v1217_v32 = vld [vmem:[%s4647_s2 + $0x238] sm:$0xff] }
 0x65b   :  { %3486 = vmatpush3.bf16.msra.mxu0 %v4228_v48  ;;  %v4233_v50 = vmul.f32 0.5, %v1208_v49 }
 0x65c   :  { %3170 = vmatprep.subr.mxu0 %v3610_v0 }
 0x65f   :  { %3171 = vmatpush3.msk.msra.mxu0 %vm352_vm4, %v4233_v50 }
 0x660   :  { %3173 = vmatmul.mubr.msk.f32.vlgmr.msra.gmra.mrb[38].mxu0 %vm324_vm5, %v3767_v59  ;;  %3502 = vmatprep.subr.bf16.mxu0 %v3612_v5  ;;  %v3503_v59 = vpack.c.bf16 %v1551_v52, %v1550_v51  ;;  %v1346_v51 = vld [vmem:[%s4647_s2 + $0x270] sm:$0xff] }
 0x661   :  { %3175 = vmatprep.mubr.msk.f32.mxu0 %vm3611_vm2, %v3610_v0 }
 0x662   :  { %3504 = vmatpush3.bf16.msra.mxu0 %v3503_v59 }
 0x663   :  { %3505 = vmatprep.subr.bf16.mxu0 %v3612_v5 }
 0x664   :  { %3176 = vmatmul.mubr.msk.f32.gmra.mrb[40].mxu0 %vm324_vm5, %v3779_v60  ;;  %v1553_v60 = vld [vmem:[%s4647_s2 + $0x2b8] sm:$0xff] }
 0x665   :  { %3178 = vmatprep.mubr.msk.f32.mxu0 %vm3611_vm2, %v3610_v0 }
 0x668   :  { %3179 = vmatmul.mubr.msk.f32.gmra.mrb[42].mxu0 %vm324_vm5, %v3788_v61  ;;  %v3506_v61 = vpack.c.bf16 %v1553_v60, %v1552_v57  ;;  %v1225_v60 = vmul.f32 %v1216_v23, %v3901_v47  ;;  %v1218_v47 = vld [vmem:[%s4647_s2 + $0x240] sm:$0xff] }
 0x669   :  { %3181 = vmatprep.mubr.msk.f32.mxu0 %vm3611_vm2, %v3610_v0 }
 0x66a   :  { %3507 = vmatpush3.bf16.msra.mxu0 %v3506_v61 }
 0x66c   :  { %3182 = vmatmul.mubr.msk.f32.gmra.mrb[44].mxu0 %vm324_vm5, %v3797_v62  ;;  %v1212_v62 = vld [vmem:[%s4647_s2 + $0x210] sm:$0xff] }
 0x66d   :  { %3184 = vmatprep.mubr.msk.f32.mxu0 %vm3611_vm2, %v3610_v0 }
 0x670   :  { %3185 = vmatmul.mubr.msk.f32.gmra.mrb[46].mxu0 %vm324_vm5, %v3806_v63  ;;  %v1221_v63 = vmul.f32 %v1212_v62, %v3865_v13  ;;  %v1344_v13 = vld [vmem:[%s4647_s2 + $0x260] sm:$0xff] }
 0x671   :  { %3187 = vmatprep.mubr.msk.f32.mxu0 %vm3611_vm2, %v3610_v0 }
 0x674   :  { %3188 = vmatmul.mubr.msk.f32.gmra.mrb[48].mxu0 %vm324_vm5, %v3815_v1  ;;  %v1213_v1 = vld [vmem:[%s4647_s2 + $0x218] sm:$0xff] }
 0x675   :  { %3190 = vmatprep.mubr.msk.f32.mxu0 %vm3611_vm2, %v3610_v0  ;;  %v1222_v15 = vmul.f32 %v1213_v1, %v3871_v16 }
 0x678   :  { %3191 = vmatmul.mubr.msk.f32.gmra.mrb[50].mxu0 %vm324_vm5, %v3824_v2 }
 0x679   :  { %3193 = vmatprep.mubr.msk.f32.mxu0 %vm3611_vm2, %v3610_v0 }
 0x67c   :  { %3194 = vmatmul.mubr.msk.f32.gmra.mrb[52].mxu0 %vm324_vm5, %v3833_v3 }
 0x67d   :  { %3196 = vmatprep.mubr.msk.f32.mxu0 %vm3611_vm2, %v3610_v0 }
 0x680   :  { %3197 = vmatmul.mubr.msk.f32.gmra.mrb[54].mxu0 %vm324_vm5, %v3842_v4 }
 0x681   :  { %3261 = vmatprep.mubr.msk.f32.mxu0 %vm3611_vm2, %v3610_v0 }
 0x733   :  { %v1299_v2 = vpop.f32.mrb[38].mxu0 }
 0x734   :  { %v1300_v3 = vadd.f32 %v1299_v2, %v1221_v63  ;;  %v3174_v4 = vpop.f32.mrb[39].mxu0 }
 0x735   :  { %v1347_v4 = vld [vmem:[%s4647_s2 + $0x278] sm:$0xff] }
 0x736   :  { %v1352_v22 = vadd.f32 %v1343_v54, %v1300_v3  ;;  %v1226_v54 = vmul.f32 %v1217_v32, %v3908_v7  ;;  %v1219_v7 = vld [vmem:[%s4647_s2 + $0x248] sm:$0xff] }
 0x737   :  { %v1304_v21 = vpop.f32.mrb[40].mxu0 }
 0x738   :  { %v1305_v25 = vadd.f32 %v1304_v21, %v1222_v15  ;;  %v3177_v26 = vpop.f32.mrb[41].mxu0  ;;  %v1361_v31 = vmax.f32 %v1352_v22, 0.0  ;;  %v1348_v21 = vld [vmem:[%s4647_s2 + $0x280] sm:$0xff] }
 0x739   :  { %v1227_v26 = vmul.f32 %v1218_v47, %v3920_v19  ;;  %v1220_v19 = vld [vmem:[%s4647_s2 + $0x250] sm:$0xff] }
 0x73a   :  { %v1353_v29 = vadd.f32 %v1344_v13, %v1305_v25 }
 0x73b   :  { %v1309_v16 = vpop.f32.mrb[42].mxu0 }
 0x73c   :  { %v1362_v33 = vmax.f32 %v1353_v29, 0.0  ;;  %v1310_v34 = vadd.f32 %v1309_v16, %v1223_v28  ;;  %v3180_v37 = vpop.f32.mrb[43].mxu0 }
 0x73d   :  { %v1228_v37 = vmul.f32 %v1219_v7, %v3927_v24  ;;  %v1684_v7 = vld [vmem:[%s4647_s2 + $0x338] sm:$0xff] }
 0x73e   :  { %v3488_v42 = vpack.c.bf16 %v1362_v33, %v1361_v31  ;;  %v1354_v52 = vadd.f32 %v1345_v40, %v1310_v34  ;;  %v1349_v34 = vld [vmem:[%s4647_s2 + $0x288] sm:$0xff] }
 0x73f   :  { %v1314_v49 = vpop.f32.mrb[44].mxu0 }
 0x740   :  { %v1315_v57 = vadd.f32 %v1314_v49, %v1224_v41  ;;  %3489 = vmatpush3.bf16.msra.mxu1 %v3488_v42  ;;  %v3183_v59 = vpop.f32.mrb[45].mxu0  ;;  %v1363_v63 = vmax.f32 %v1354_v52, 0.0  ;;  %v1350_v42 = vld [vmem:[%s4647_s2 + $0x290] sm:$0xff]  ;;  %v1229_v52 = vmul.f32 %v1220_v19, %v3936_v35  ;;  %v1674_v35 = vld [vmem:[%s4647_s2 + $0x2e8] sm:$0xff] }
 0x741   :  { %3490 = vmatprep.subr.bf16.mxu1 %v3612_v5  ;;  %v1351_v59 = vld [vmem:[%s4647_s2 + $0x298] sm:$0xff] }
 0x742   :  { %v1355_v61 = vadd.f32 %v1346_v51, %v1315_v57 }
 0x743   :  { %v1319_v62 = vpop.f32.mrb[46].mxu0 }
 0x744   :  { %v1364_v1 = vmax.f32 %v1355_v61, 0.0  ;;  %v1320_v2 = vadd.f32 %v1319_v62, %v1225_v60  ;;  %v3186_v3 = vpop.f32.mrb[47].mxu0 }
 0x746   :  { %v3491_v15 = vpack.c.bf16 %v1364_v1, %v1363_v63  ;;  %v1356_v13 = vadd.f32 %v1347_v4, %v1320_v2 }
 0x747   :  { %v1324_v20 = vpop.f32.mrb[48].mxu0 }
 0x748   :  { %v1325_v22 = vadd.f32 %v1324_v20, %v1226_v54  ;;  %3492 = vmatpush3.bf16.msra.mxu1 %v3491_v15  ;;  %v3189_v25 = vpop.f32.mrb[49].mxu0  ;;  %v1365_v30 = vmax.f32 %v1356_v13, 0.0 }
 0x749   :  { %3493 = vmatprep.subr.bf16.mxu1 %v3612_v5  ;;  %v1682_v25 = vld [vmem:[%s4647_s2 + $0x328] sm:$0xff] }
 0x74a   :  { %v1357_v28 = vadd.f32 %v1348_v21, %v1325_v22 }
 0x74b   :  { %v1329_v29 = vpop.f32.mrb[50].mxu0 }
 0x74c   :  { %v1366_v16 = vmax.f32 %v1357_v28, 0.0  ;;  %v1330_v31 = vadd.f32 %v1329_v29, %v1227_v26  ;;  %v3192_v33 = vpop.f32.mrb[51].mxu0  ;;  %v1683_v26 = vld [vmem:[%s4647_s2 + $0x330] sm:$0xff] }
 0x74d   :  { %v3521_v28 = vpack.c.bf16 %v1683_v26, %v1682_v25  ;;  %v948_v26 = vld [vmem:[%s4647_s2 + $0x200] sm:$0x3] }
 0x74e   :  { %v3494_v40 = vpack.c.bf16 %v1366_v16, %v1365_v30  ;;  %v1358_v23 = vadd.f32 %v1349_v34, %v1330_v31  ;;  %v1554_v30 = vld [vmem:[%s4647_s2 + $0x2c0] sm:$0xff]  ;;  %v1555_v34 = vld [vmem:[%s4647_s2 + $0x2c8] sm:$0xff] }
 0x74f   :  { %v1334_v41 = vpop.f32.mrb[52].mxu0 }
 0x750   :  { %v1335_v49 = vadd.f32 %v1334_v41, %v1228_v37  ;;  %3495 = vmatpush3.bf16.msra.mxu1 %v3494_v40  ;;  %v3195_v51 = vpop.f32.mrb[53].mxu0  ;;  %v1367_v60 = vmax.f32 %v1358_v23, 0.0  ;;  %v1556_v23 = vld [vmem:[%s4647_s2 + $0x2d0] sm:$0xff] }
 0x751   :  { %3496 = vmatprep.subr.bf16.mxu1 %v3612_v5 }
 0x752   :  { %v1359_v57 = vadd.f32 %v1350_v42, %v1335_v49 }
 0x753   :  { %v1339_v24 = vpop.f32.mrb[54].mxu0 }
 0x754   :  { %v1368_v61 = vmax.f32 %v1359_v57, 0.0  ;;  %v1340_v32 = vadd.f32 %v1339_v24, %v1229_v52  ;;  %v3198_v62 = vpop.f32.mrb[55].mxu0 }
 0x756   :  { %v3497_v63 = vpack.c.bf16 %v1368_v61, %v1367_v60  ;;  %v1360_v1 = vadd.f32 %v1351_v59, %v1340_v32 }
 0x758   :  { %3498 = vmatpush3.bf16.msra.mxu1 %v3497_v63  ;;  %v1369_v2 = vmax.f32 %v1360_v1, 0.0 }
 0x759   :  { %3215 = vmatprep.subr.mxu1 %v3610_v0 }
 0x75c   :  { %3216 = vmatpush3.msra.mxu1 %v1369_v2 }
 0x75d   :  { %3218 = vmatmul.mubr.msk.f32.vlgmr.msra.gmra.mrb[32].mxu1 %vm493_vm6, %v3950_v56  ;;  %3499 = vmatprep.subr.bf16.mxu1 %v3612_v5  ;;  %v1675_v56 = vld [vmem:[%s4647_s2 + $0x2f0] sm:$0xff] }
 0x75e   :  { %3501 = vmatpush3.bf16.msra.mxu1 %v4228_v48  ;;  %3220 = vmatprep.mubr.msk.f32.mxu1 %vm3611_vm2, %v3610_v0 }
 0x75f   :  { %3236 = vmatprep.subr.mxu1 %v3610_v0 }
 0x761   :  { %3221 = vmatmul.mubr.msk.f32.gmra.mrb[34].mxu1 %vm493_vm6, %v3961_v58  ;;  %v1676_v58 = vld [vmem:[%s4647_s2 + $0x2f8] sm:$0xff] }
 0x762   :  { %3237 = vmatpush3.msk.msra.mxu1 %vm352_vm4, %v4233_v50  ;;  %3223 = vmatprep.mubr.msk.f32.mxu1 %vm3611_vm2, %v3610_v0 }
 0x763   :  { %3508 = vmatprep.subr.bf16.mxu1 %v3612_v5 }
 0x765   :  { %3224 = vmatmul.mubr.msk.f32.gmra.mrb[36].mxu1 %vm493_vm6, %v3973_v55  ;;  %v3509_v55 = vpack.c.bf16 %v1675_v56, %v1674_v35 }
 0x766   :  { %3226 = vmatprep.mubr.msk.f32.mxu1 %vm3611_vm2, %v3610_v0 }
 0x769   :  { %3227 = vmatmul.mubr.msk.f32.gmra.mrb[38].mxu1 %vm493_vm6, %v3982_v6  ;;  %v1677_v6 = vld [vmem:[%s4647_s2 + $0x300] sm:$0xff] }
 0x76a   :  { %3229 = vmatprep.mubr.msk.f32.mxu1 %vm3611_vm2, %v3610_v0 }
 0x76d   :  { %3230 = vmatmul.mubr.msk.f32.gmra.mrb[40].mxu1 %vm493_vm6, %v3991_v8  ;;  %v3512_v8 = vpack.c.bf16 %v1677_v6, %v1676_v58 }
 0x76e   :  { %3238 = vmatprep.mubr.msk.f32.mxu1 %vm3611_vm2, %v3610_v0 }
 0x771   :  { %3239 = vmatmul.mubr.msk.f32.vlgmr.msra.gmra.mrb[32].mxu1 %vm324_vm5, %v4000_v9  ;;  %v1678_v9 = vld [vmem:[%s4647_s2 + $0x308] sm:$0xff] }
 0x772   :  { %3241 = vmatprep.mubr.msk.f32.mxu1 %vm3611_vm2, %v3610_v0  ;;  %3510 = vmatpush3.bf16.msra.mxu1 %v3509_v55  ;;  %v2036_v55 = vld [vmem:[%s4647_s2 + $0x3b0] sm:$0xff] }
 0x773   :  { %3511 = vmatprep.subr.bf16.mxu1 %v3612_v5 }
 0x775   :  { %3242 = vmatmul.mubr.msk.f32.gmra.mrb[34].mxu1 %vm324_vm5, %v4009_v10  ;;  %v1679_v10 = vld [vmem:[%s4647_s2 + $0x310] sm:$0xff] }
 0x776   :  { %3244 = vmatprep.mubr.msk.f32.mxu1 %vm3611_vm2, %v3610_v0  ;;  %3513 = vmatpush3.bf16.msra.mxu1 %v3512_v8 }
 0x777   :  { %3514 = vmatprep.subr.bf16.mxu1 %v3612_v5 }
 0x779   :  { %3245 = vmatmul.mubr.msk.f32.gmra.mrb[36].mxu1 %vm324_vm5, %v4018_v11  ;;  %v3515_v11 = vpack.c.bf16 %v1679_v10, %v1678_v9 }
 0x77a   :  { %3247 = vmatprep.mubr.msk.f32.mxu1 %vm3611_vm2, %v3610_v0 }
 0x77b   :  { %3516 = vmatpush3.bf16.msra.mxu1 %v3515_v11 }
 0x77c   :  { %3517 = vmatprep.subr.bf16.mxu1 %v3612_v5 }
 0x77d   :  { %3248 = vmatmul.mubr.msk.f32.gmra.mrb[38].mxu1 %vm324_vm5, %v4027_v12  ;;  %v1680_v12 = vld [vmem:[%s4647_s2 + $0x318] sm:$0xff] }
 0x77e   :  { %3250 = vmatprep.mubr.msk.f32.mxu1 %vm3611_vm2, %v3610_v0 }
 0x781   :  { %3251 = vmatmul.mubr.msk.f32.gmra.mrb[40].mxu1 %vm324_vm5, %v4036_v14  ;;  %v1681_v14 = vld [vmem:[%s4647_s2 + $0x320] sm:$0xff] }
 0x782   :  { %3300 = vmatprep.mubr.msk.f32.mxu1 %vm3611_vm2, %v3610_v0  ;;  %v3518_v48 = vpack.c.bf16 %v1681_v14, %v1680_v12 }
 0x784   :  { %3519 = vmatpush3.bf16.msra.mxu1 %v3518_v48 }
 0x785   :  { %3520 = vmatprep.subr.bf16.mxu1 %v3612_v5 }
 0x788   :  { %3522 = vmatpush3.bf16.msra.mxu1 %v3521_v28  ;;  %v1031_v28 = vadd.f32 %v4211_v44, %v948_v26  ;;  %v2304_v44 = vld [vmem:[%s4647_s2 + $0x3f0] sm:$0xff] }
 0x789   :  { %3523 = vmatprep.subr.bf16.mxu1 %v3612_v5 }
 0x844   :  { %v1526_v50 = vpop.f32.mrb[32].mxu1 }
 0x845   :  { %v3240_v3 = vpop.f32.mrb[33].mxu1  ;;  %3262 = vmatmul.mubr.msk.f32.vlgmr.msra.gmra.mrb[56].mxu0 %vm713_vm7, %v1526_v50 }
 0x846   :  { %3264 = vmatprep.mubr.msk.f32.mxu0 %vm3611_vm2, %v3610_v0 }
 0x848   :  { %v1531_v4 = vpop.f32.mrb[34].mxu1 }
 0x849   :  { %v3243_v54 = vpop.f32.mrb[35].mxu1  ;;  %3265 = vmatmul.mubr.msk.f32.gmra.mrb[58].mxu0 %vm713_vm7, %v1531_v4 }
 0x84a   :  { %3267 = vmatprep.mubr.msk.f32.mxu0 %vm3611_vm2, %v3610_v0 }
 0x84c   :  { %v1536_v15 = vpop.f32.mrb[36].mxu1 }
 0x84d   :  { %v3246_v47 = vpop.f32.mrb[37].mxu1  ;;  %3268 = vmatmul.mubr.msk.f32.gmra.mrb[60].mxu0 %vm713_vm7, %v1536_v15  ;;  %v1942_v15 = vld [vmem:[%s4647_s2 + $0x378] sm:$0xff] }
 0x84e   :  { %3270 = vmatprep.mubr.msk.f32.mxu0 %vm3611_vm2, %v3610_v0  ;;  %v1943_v47 = vld [vmem:[%s4647_s2 + $0x380] sm:$0xff] }
 0x850   :  { %v1541_v20 = vpop.f32.mrb[38].mxu1 }
 0x851   :  { %v3249_v21 = vpop.f32.mrb[39].mxu1  ;;  %3271 = vmatmul.mubr.msk.f32.gmra.mrb[62].mxu0 %vm713_vm7, %v1541_v20  ;;  %v1945_v20 = vld [vmem:[%s4647_s2 + $0x390] sm:$0xff] }
 0x852   :  { %3273 = vmatprep.mubr.msk.f32.mxu0 %vm3611_vm2, %v3610_v0  ;;  %v947_v21 = vld [vmem:[%s4647_s2 + $0x1f8] sm:$0xff] }
 0x853   :  { %v1026_v25 = vadd.f32 %v4213_v45, %v947_v21  ;;  %v2038_v45 = vld [vmem:[%s4647_s2 + $0x3c0] sm:$0xff] }
 0x854   :  { %v1546_v13 = vpop.f32.mrb[40].mxu1 }
 0x855   :  { %v3252_v22 = vpop.f32.mrb[41].mxu1  ;;  %3274 = vmatmul.mubr.msk.f32.gmra.mrb[64].mxu0 %vm713_vm7, %v1546_v13  ;;  %v3540_v13 = vpack.c.bf16 %v1943_v47, %v1942_v15  ;;  %v2729_v15 = vld [vmem:[%s4647_s2 + $0x3e8] ss:$0 sm:$0xff] }
 0x856   :  { %3325 = vmatprep.mubr.msk.f32.mxu0 %vm949_vm9, %v4160_v18  ;;  %v1685_v18 = vld [vmem:[%s4647_s2 + $0x340] sm:$0xff] }
 0x857   :  { %v3524_v29 = vpack.c.bf16 %v1685_v18, %v1684_v7  ;;  %v1791_v18 = vld [vmem:[%s4647_s2 + $0x360] sm:$0xff] }
 0x859   :  { %3525 = vmatpush3.bf16.msra.mxu1 %v3524_v29  ;;  %v2305_v29 = vld [vmem:[%s4647_s2 + $0x3f8] sm:$0xff] }
 0x918   :  { %v1640_v16 = vpop.f32.mrb[56].mxu0 }
 0x919   :  { %v1641_v31 = vadd.f32 %v1640_v16, %v1554_v30  ;;  %v3263_v33 = vpop.f32.mrb[57].mxu0  ;;  %v1792_v30 = vld [vmem:[%s4647_s2 + $0x368] sm:$0x3] }
 0x91b   :  { %v1664_v37 = vmax.f32 %v1641_v31, 0.0 }
 0x91c   :  { %v1645_v40 = vpop.f32.mrb[58].mxu0 }
 0x91d   :  { %v1669_v19 = vmul.f32 %v1664_v37, %v4103_v17  ;;  %v1646_v41 = vadd.f32 %v1645_v40, %v1555_v34  ;;  %v3266_v42 = vpop.f32.mrb[59].mxu0  ;;  %v1557_v17 = vld [vmem:[%s4647_s2 + $0x2d8] sm:$0xff]  ;;  %v3565_v34 = vpack.c.bf16 %v2305_v29, %v2304_v44  ;;  %v2306_v40 = vld [vmem:[%s4647_s2 + $0x400] sm:$0xff] }
 0x91e   :  { %v1034_v42 = vld [vmem:[%s4647_s2 + $0x208] sm:$0x3f] }
 0x91f   :  { %v1665_v49 = vmax.f32 %v1646_v41, 0.0  ;;  %3301 = vmatmul.mubr.msk.f32.vlgmr.msra.gmra.mrb[42].mxu1 %vm841_vm8, %v1669_v19  ;;  %v2307_v19 = vld [vmem:[%s4647_s2 + $0x408] sm:$0xff] }
 0x920   :  { %v1650_v51 = vpop.f32.mrb[60].mxu0  ;;  %3303 = vmatprep.mubr.msk.f32.mxu1 %vm3611_vm2, %v3610_v0  ;;  %v3568_v41 = vpack.c.bf16 %v2307_v19, %v2306_v40 }
 0x921   :  { %v1670_v52 = vmul.f32 %v1665_v49, %v4112_v27  ;;  %v1651_v57 = vadd.f32 %v1650_v51, %v1556_v23  ;;  %v3269_v24 = vpop.f32.mrb[61].mxu0  ;;  %v1558_v27 = vld [vmem:[%s4647_s2 + $0x2e0] sm:$0xf]  ;;  %v1105_v49 = vadd.f32 %v4215_v46, %v1034_v42 }
 0x922   :  { %v2128_v24 = vld [vmem:[%s4647_s2 + $0x3d8] sm:$0xff]  ;;  %v2034_v46 = vld [vmem:[%s4647_s2 + $0x3a0] sm:$0xff] }
 0x923   :  { %v1666_v59 = vmax.f32 %v1651_v57, 0.0  ;;  %3304 = vmatmul.mubr.msk.f32.gmra.mrb[44].mxu1 %vm841_vm8, %v1670_v52 }
 0x924   :  { %v1655_v60 = vpop.f32.mrb[62].mxu0  ;;  %3306 = vmatprep.mubr.msk.f32.mxu1 %vm3611_vm2, %v3610_v0 }
 0x925   :  { %v1671_v61 = vmul.f32 %v1666_v59, %v4124_v36  ;;  %v1656_v32 = vadd.f32 %v1655_v60, %v1557_v17  ;;  %v3272_v62 = vpop.f32.mrb[63].mxu0  ;;  %v2129_v17 = vld [vmem:[%s4647_s2 + $0x3e0] sm:$0xff]  ;;  %v2035_v60 = vld [vmem:[%s4647_s2 + $0x3a8] sm:$0xff] }
 0x926   :  { %v3556_v59 = vpack.c.bf16 %v2129_v17, %v2128_v24  ;;  %v2719_v62 = vld [vmem:[%s4647_s2 + $0x398] ss:$0 sm:$0xff] }
 0x927   :  { %v1667_v63 = vmax.f32 %v1656_v32, 0.0  ;;  %3307 = vmatmul.mubr.msk.f32.gmra.mrb[46].mxu1 %vm841_vm8, %v1671_v61  ;;  %v3560_v61 = vpack.c.bf16 %v2035_v60, %v2034_v46  ;;  %v2722_v32 = vld [vmem:[%s4647_s2 + $0x3d0] ss:$0 sm:$0xff] }
 0x928   :  { %v1660_v1 = vpop.f32.mrb[64].mxu0  ;;  %3309 = vmatprep.mubr.msk.f32.mxu1 %vm3611_vm2, %v3610_v0 }
 0x929   :  { %v1672_v2 = vmul.f32 %v1667_v63, %v4136_v43  ;;  %v1661_v35 = vadd.f32 %v1660_v1, %v1558_v27  ;;  %v3275_v56 = vpop.f32.mrb[65].mxu0  ;;  %v2037_v43 = vld [vmem:[%s4647_s2 + $0x3b8] sm:$0xff] }
 0x92a   :  { %v3548_v6 = vpack.c.bf16 %v2037_v43, %v2036_v55 }
 0x92b   :  { %v1668_v58 = vmax.f32 %v1661_v35, 0.0  ;;  %3310 = vmatmul.mubr.msk.f32.gmra.mrb[48].mxu1 %vm841_vm8, %v1672_v2 }
 0x92c   :  { %3312 = vmatprep.mubr.msk.f32.mxu1 %vm3611_vm2, %v3610_v0  ;;  %3549 = vmatprep.subr.bf16.mxu1 %v3548_v6 }
 0x92d   :  { %v1673_v36 = vmul.f32 %v1668_v58, %v4148_v53  ;;  %3551 = vmatpush3.bf16.msra.mxu1 %v3548_v6 }
 0x92f   :  { %3313 = vmatmul.mubr.msk.f32.gmra.mrb[50].mxu1 %vm841_vm8, %v1673_v36 }
 0x9f2   :  { %v1767_v8 = vpop.f32.mrb[42].mxu1 }
 0x9f3   :  { %v3302_v9 = vpop.f32.mrb[43].mxu1 }
 0x9f4   :  { %v2390_v9 = vld [vmem:[%s4647_s2 + $0x430] sm:$0xff] }
 0x9f6   :  { %v1772_v10 = vpop.f32.mrb[44].mxu1 }
 0x9f7   :  { %v3526_v11 = vpack.c.bf16 %v1772_v10, %v1767_v8  ;;  %v3305_v12 = vpop.f32.mrb[45].mxu1  ;;  %v2389_v8 = vld [vmem:[%s4647_s2 + $0x428] sm:$0xff] }
 0x9f8   :  { %v3571_v10 = vpack.c.bf16 %v2390_v9, %v2389_v8  ;;  %v2391_v12 = vld [vmem:[%s4647_s2 + $0x438] sm:$0xff] }
 0x9f9   :  { %3527 = vmatprep.subr.bf16.mxu0 %v3526_v11 }
 0x9fa   :  { %v1777_v53 = vpop.f32.mrb[46].mxu1  ;;  %3529 = vmatpush3.bf16.msra.mxu0 %v3526_v11 }
 0x9fb   :  { %v3308_v14 = vpop.f32.mrb[47].mxu1 }
 0x9fe   :  { %v1782_v48 = vpop.f32.mrb[48].mxu1 }
 0x9ff   :  { %v3530_v50 = vpack.c.bf16 %v1782_v48, %v1777_v53  ;;  %v3311_v3 = vpop.f32.mrb[49].mxu1  ;;  %v2392_v53 = vld [vmem:[%s4647_s2 + $0x440] sm:$0xff]  ;;  %v1871_v48 = vld [vmem:[%s4647_s2 + $0x370] sm:$0x3f] }
 0xa00   :  { %v3574_v14 = vpack.c.bf16 %v2392_v53, %v2391_v12  ;;  %v2472_v3 = vld [vmem:[%s4647_s2 + $0x450] sm:$0xff] }
 0xa01   :  { %3531 = vmatprep.subr.bf16.mxu0 %v3530_v50 }
 0xa02   :  { %v1787_v4 = vpop.f32.mrb[50].mxu1  ;;  %3533 = vmatpush3.bf16.msra.mxu0 %v3530_v50 }
 0xa03   :  { %v3314_v54 = vpop.f32.mrb[51].mxu1  ;;  %3323 = vmatprep.subr.msk.mxu0 %vm42_vm0, %v1787_v4 }
 0xa06   :  { %3324 = vmatpush3.msk.msra.mxu0 %vm42_vm0, %v1787_v4 }
 0xa07   :  { %3326 = vmatmul.mubr.msk.f32.vlgmr.msra.gmra.mrb[66].mxu0 %vm949_vm9, %v4168_v38  ;;  %3534 = vmatprep.subr.bf16.mxu0 %v3612_v5  ;;  %v1944_v38 = vld [vmem:[%s4647_s2 + $0x388] sm:$0xff] }
 0xa08   :  { %3536 = vmatpush3.bf16.msra.mxu0 %v3526_v11  ;;  %3338 = vmatprep.mubr.msk.f32.mxu0 %vm3611_vm2, %v3610_v0  ;;  %v3544_v22 = vpack.c.bf16 %v1945_v20, %v1944_v38 }
 0xa09   :  { %3537 = vmatprep.subr.bf16.mxu0 %v3612_v5 }
 0xa0c   :  { %3539 = vmatpush3.bf16.msra.mxu0 %v3530_v50 }
 0xa0d   :  { %3336 = vmatprep.subr.mxu0 %v3610_v0 }
 0xa10   :  { %3337 = vmatpush3.msk.msra.mxu0 %vm42_vm0, %v1787_v4  ;;  %v2473_v4 = vld [vmem:[%s4647_s2 + $0x458] sm:$0xff] }
 0xa11   :  { %3339 = vmatmul.mubr.msk.f32.vlgmr.msra.gmra.mrb[68].mxu0 %vm949_vm9, %v4181_v39  ;;  %3541 = vmatprep.subr.bf16.mxu0 %v3540_v13  ;;  %v2039_v39 = vld [vmem:[%s4647_s2 + $0x3c8] sm:$0xff]  ;;  %v3577_v54 = vpack.c.bf16 %v2473_v4, %v2472_v3 }
 0xa12   :  { %3543 = vmatpush3.bf16.msra.mxu0 %v3540_v13  ;;  %3349 = vmatprep.mubr.msk.f32.mxu0 %vm713_vm7, %v1026_v25  ;;  %v3552_v7 = vpack.c.bf16 %v2039_v39, %v2038_v45  ;;  %v2387_v13 = vld [vmem:[%s4647_s2 + $0x418] sm:$0xff]  ;;  %v2730_v25 = vld [vmem:[%s4647_s2 + $0x410] ss:$0 sm:$0xff] }
 0xa13   :  { %3545 = vmatprep.subr.bf16.mxu0 %v3544_v22 }
 0xa14   :  { %3553 = vmatprep.subr.bf16.mxu1 %v3552_v7 }
 0xa15   :  { %3555 = vmatpush3.bf16.msra.mxu1 %v3552_v7 }
 0xa16   :  { %3547 = vmatpush3.bf16.msra.mxu0 %v3544_v22  ;;  %3564 = vmatprep.subr.bf16.mxu1 %v3612_v5  ;;  %v2388_v22 = vld [vmem:[%s4647_s2 + $0x420] sm:$0xff] }
 0xa17   :  { %3557 = vmatprep.subr.bf16.mxu0 %v3556_v59  ;;  %v3580_v39 = vpack.c.bf16 %v2388_v22, %v2387_v13 }
 0xa19   :  { %3350 = vmatmul.mubr.msk.f32.vlgmr.msra.gmra.mrb[70].mxu0 %vm713_vm7, %v1031_v28 }
 0xa1a   :  { %3559 = vmatpush3.bf16.msra.mxu0 %v3556_v59 }
 0xa1b   :  { %3561 = vmatprep.subr.bf16.mxu0 %v3560_v61 }
 0xada   :  { %v3327_v16 = vpop.f32.mrb[66].mxu0 }
 0xadb   :  { %v1862_v31 = vpop.f32.mrb[67].mxu0  ;;  %v1868_v37 = vadd.f32 %v3327_v16, %v1792_v30 }
 0xadc   :  { %v1863_v33 = vadd.f32 %v1862_v31, %v1791_v18  ;;  %v2736_v31 = vld [vmem:[%s4647_s2 + $0x460] ss:$0 sm:$0xff] }
 0xade   :  { %3360 = vmatprep.mubr.msk.f32.mxu1 %vm713_vm7, %v1863_v33 }
 0xadf   :  { %3361 = vmatmul.mubr.msk.f32.vlgmr.msra.gmra.mrb[52].mxu1 %vm713_vm7, %v1868_v37 }
 0xae0   :  { %3566 = vmatpush3.bf16.msra.mxu1 %v3565_v34  ;;  %3385 = vmatprep.mubr.msk.f32.mxu1 %vm3611_vm2, %v3610_v0 }
 0xae1   :  { %3567 = vmatprep.subr.bf16.mxu1 %v3612_v5 }
 0xae4   :  { %3569 = vmatpush3.bf16.msra.mxu1 %v3568_v41  ;;  %v1938_v23 = vpop.f32.mrb[68].mxu0 }
 0xae5   :  { %v3340_v51 = vpop.f32.mrb[69].mxu0  ;;  %v1939_v50 = vadd.f32 %v1938_v23, %v1871_v48 }
 0xae7   :  { %3386 = vmatmul.mubr.msk.f32.vlgmr.msra.gmra.mrb[54].mxu1 %vm713_vm7, %v1105_v49 }
 0xaec   :  { %v3351_v52 = vpop.f32.mrb[70].mxu0 }
 0xaed   :  { %v2023_v57 = vpop.f32.mrb[71].mxu0  ;;  %v2029_v43 = vadd.f32 %v3351_v52, %v2719_v62 }
 0xaee   :  { %v2024_v2 = vadd.f32 %v2719_v62, %v2023_v57 }
 0xaef   :  { %v2033_v11 = vmax.f32 %v2029_v43, 0.0 }
 0xaf0   :  { %v2032_v36 = vmax.f32 %v2024_v2, 0.0 }
 0xbb2   :  { %v3362_v27 = vpop.f32.mrb[52].mxu1 }
 0xbb3   :  { %v2123_v63 = vadd.f32 %v3362_v27, %v2722_v32  ;;  %v2117_v1 = vpop.f32.mrb[53].mxu1 }
 0xbb4   :  { %v2118_v35 = vadd.f32 %v2722_v32, %v2117_v1 }
 0xbb5   :  { %v2127_v58 = vmax.f32 %v2123_v63, 0.0 }
 0xbb6   :  { %v2126_v56 = vmax.f32 %v2118_v35, 0.0 }
 0xbb8   :  { %3367 = vmatprep.mubr.msk.f32.mxu0 %vm2130_vm10, %v2126_v56 }
 0xbb9   :  { %3368 = vmatmul.mubr.msk.f32.vlgmr.msra.gmra.mrb[72].mxu0 %vm2130_vm10, %v2127_v58 }
 0xbba   :  { %v2382_v55 = vpop.f32.mrb[54].mxu1  ;;  %3374 = vmatprep.mubr.msk.f32.mxu0 %vm2130_vm10, %v2032_v36  ;;  %3563 = vmatpush3.bf16.msra.mxu0 %v3560_v61 }
 0xbbb   :  { %v3387_v6 = vpop.f32.mrb[55].mxu1  ;;  %3570 = vmatprep.subr.bf16.mxu0 %v3612_v5  ;;  %v2383_v7 = vadd.f32 %v2730_v25, %v2382_v55 }
 0xbbd   :  { %v2386_v44 = vmax.f32 %v2383_v7, 0.0 }
 0xbc1   :  { %3375 = vmatmul.mubr.msk.f32.vlgmr.msra.gmra.mrb[72].mxu0 %vm2130_vm10, %v2033_v11 }
 0xbc2   :  { %3572 = vmatpush3.bf16.msra.mxu0 %v3571_v10  ;;  %3396 = vmatprep.mubr.msk.f32.mxu0 %vm3611_vm2, %v3610_v0 }
 0xbc3   :  { %3573 = vmatprep.subr.bf16.mxu0 %v3612_v5 }
 0xbc6   :  { %3575 = vmatpush3.bf16.msra.mxu0 %v3574_v14 }
 0xbc7   :  { %3576 = vmatprep.subr.bf16.mxu0 %v3612_v5 }
 0xbc9   :  { %3397 = vmatmul.mubr.msk.f32.vlgmr.msra.gmra.mrb[74].mxu0 %vm713_vm7, %v1939_v50 }
 0xbca   :  { %3403 = vmatprep.mubr.msk.f32.mxu0 %vm3611_vm2, %v3610_v0  ;;  %3578 = vmatpush3.bf16.msra.mxu0 %v3577_v54 }
 0xbcb   :  { %3579 = vmatprep.subr.bf16.mxu0 %v3612_v5  ;;  %v2732_v5 = vld [vmem:[%s4647_s2 + $0x448] ss:$0 sm:$0xff] }
 0xc94   :  { %v3376_v47 = vpop.f32.mrb[72].mxu0 }
 0xc95   :  { %v2299_v38 = vadd.f32 %v3376_v47, %v2729_v15  ;;  %v2284_v20 = vpop.f32.mrb[73].mxu0 }
 0xc96   :  { %v2298_v21 = vadd.f32 %v2729_v15, %v2284_v20 }
 0xc97   :  { %2303 = vst.msk [vmem:[%s4650_s3 + $0x8] sm:$0x3] %vm2302_vm11, %v2299_v38 }
 0xc98   :  { %2301 = vst.msk [vmem:[%s4650_s3] sm:$0xff] %vm2300_vm12, %v2298_v21 }
 0xc9c   :  { %v2467_v26 = vpop.f32.mrb[74].mxu0 }
 0xc9d   :  { %v2468_v28 = vadd.f32 %v2732_v5, %v2467_v26  ;;  %v3398_v45 = vpop.f32.mrb[75].mxu0 }
 0xc9f   :  { %v2471_v18 = vmax.f32 %v2468_v28, 0.0 }
 0xca1   :  { %3404 = vmatmul.mubr.msk.f32.vlgmr.msra.gmra.mrb[76].mxu0 %vm2130_vm10, %v2471_v18 }
 0xca2   :  { %3581 = vmatpush3.bf16.msra.mxu0 %v3580_v39  ;;  %3410 = vmatprep.mubr.msk.f32.mxu0 %vm3611_vm2, %v3610_v0 }
 0xca5   :  { %3411 = vmatmul.mubr.msk.f32.vlgmr.msra.gmra.mrb[78].mxu0 %vm2130_vm10, %v2386_v44 }
 0xd74   :  { %v2543_v29 = vpop.f32.mrb[76].mxu0 }
 0xd75   :  { %v3405_v30 = vpop.f32.mrb[77].mxu0 }
 0xd78   :  { %v2616_v16 = vpop.f32.mrb[78].mxu0 }
 0xd79   :  { %v2617_v33 = vadd.f32 %v2616_v16, %v2543_v29  ;;  %v3412_v34 = vpop.f32.mrb[79].mxu0 }
 0xd7b   :  { %v2625_v37 = vadd.f32 %v2736_v31, %v2617_v33 }
 0xd7d   :  { %2627 = vst.msk [vmem:[%s4651_s4] sm:$0x3f] %vm2626_vm13, %v2625_v37 }

</bundles_post_ra>
